<compile_context>
chip_gen: v7x
topology: tpu7x:2x2x1
jax: 0.10.0
libtpu: 0.0.40
codegen_flags: <defaults>
</compile_context>

<pallas_src>
import math
from functools import partial

import jax
import jax.numpy as jnp
from jax.experimental import pallas as pl
from jax.experimental.pallas import tpu as pltpu

# ---------------- small synthetic BERT config ----------------
VOCAB = 128
TYPE_VOCAB = 2
MAX_POS = 32
HIDDEN = 32
N_HEADS = 2
HEAD_DIM = HIDDEN // N_HEADS
INTERMEDIATE = 64
N_LAYERS = 2
LN_EPS = 1e-12


# ---------------- helpers (run inside the kernel) ----------------
def _layernorm(x, g, b, eps):
    mu = jnp.mean(x, axis=-1, keepdims=True)
    var = jnp.mean(jnp.square(x - mu), axis=-1, keepdims=True)
    return (x - mu) * jax.lax.rsqrt(var + eps) * g + b


def _erf(x):
    # Abramowitz & Stegun 7.1.26 (max abs err ~1.5e-7): erf-GELU without relying
    # on a lax.erf lowering inside Mosaic.  Uses only abs/exp/where (VPU+EUP).
    t = 1.0 / (1.0 + 0.3275911 * jnp.abs(x))
    poly = t * (0.254829592 + t * (-0.284496736 + t * (1.421413741
            + t * (-1.453152027 + t * 1.061405429))))
    y = 1.0 - poly * jnp.exp(-x * x)
    return jnp.where(x >= 0.0, y, -y)


def _gelu(x):
    return 0.5 * x * (1.0 + _erf(x * (1.0 / math.sqrt(2.0))))


# ---------------- fused whole-encoder kernel ----------------
# One grid step == one batch element:
#   h = LN(word+pos+type embeddings)
#   for each layer: qkv -> per-head softmax(qk^T*scale+mask)v -> concat -> Wo
#                   -> LN(residual) -> GELU FFN -> LN(residual)
#   pooled = tanh(h[CLS] @ Wp + bp)            (the only HBM output)
def _bert_kernel(emb_ref, m_ref, eg_ref, eb_ref,
                 wqkv_ref, bqkv_ref, wo_ref, bo_ref, l1g_ref, l1b_ref,
                 wi_ref, bi_ref, wo2_ref, bo2_ref, l2g_ref, l2b_ref,
                 pw_ref, pb_ref, o_ref,
                 *, n_layers, n_heads, head_dim, scale, eps):
    H = n_heads * head_dim
    f32, bf16 = jnp.float32, jnp.bfloat16

    mask = m_ref[0]                                                  # (1, S) additive
    h = _layernorm(emb_ref[0].astype(f32), eg_ref[...], eb_ref[...], eps)   # (S, H) f32

    for l in range(n_layers):                                        # unrolled at trace time
        hb = h.astype(bf16)
        qkv = jnp.dot(hb, wqkv_ref[l],
                      preferred_element_type=f32) + bqkv_ref[l]      # (S, 3H) f32

        ctx_heads = []
        for hd in range(n_heads):
            lo = hd * head_dim
            qh = qkv[:, lo:lo + head_dim].astype(bf16)               # (S, Dh)
            kh = qkv[:, H + lo:H + lo + head_dim].astype(bf16)
            vh = qkv[:, 2 * H + lo:2 * H + lo + head_dim].astype(bf16)
            s = jax.lax.dot_general(qh, kh, (((1,), (1,)), ((), ())),
                                    preferred_element_type=f32)      # (S, S)
            s = s * scale + mask
            s = s - jnp.max(s, axis=-1, keepdims=True)
            p = jnp.exp(s)
            p = p / jnp.sum(p, axis=-1, keepdims=True)               # exact softmax (f32)
            ctx_heads.append(jnp.dot(p.astype(bf16), vh,
                                     preferred_element_type=f32))    # (S, Dh)

        ctx = jnp.concatenate(ctx_heads, axis=-1).astype(bf16)       # (S, H)
        attn = jnp.dot(ctx, wo_ref[l],
                       preferred_element_type=f32) + bo_ref[l]       # (S, H)

        h1 = _layernorm(attn + h, l1g_ref[l], l1b_ref[l], eps)
        inter = jnp.dot(h1.astype(bf16), wi_ref[l],
                        preferred_element_type=f32) + bi_ref[l]      # (S, I)
        inter = _gelu(inter)
        ffn = jnp.dot(inter.astype(bf16), wo2_ref[l],
                      preferred_element_type=f32) + bo2_ref[l]       # (S, H)
        h = _layernorm(ffn + h1, l2g_ref[l], l2b_ref[l], eps)

    # fused pooler: CLS row is already resident in vregs -- no HBM round trip.
    cls = h[0:1, :].astype(bf16)                                     # (1, H)
    pooled = jnp.tanh(jnp.dot(cls, pw_ref[...],
                              preferred_element_type=f32) + pb_ref[...])    # (1, H)
    o_ref[0] = pooled


# ---------------- parameter init (deterministic, synthetic) ----------------
def init_params(key):
    keys = iter(jax.random.split(key, 4 + 4 * N_LAYERS))

    def nrm(shape):
        return 0.02 * jax.random.normal(next(keys), shape, jnp.float32)

    params = {
        "word_emb": nrm((VOCAB, HIDDEN)),
        "pos_emb": nrm((MAX_POS, HIDDEN)),
        "type_emb": nrm((TYPE_VOCAB, HIDDEN)),
        "emb_ln_g": jnp.ones((HIDDEN,), jnp.float32),
        "emb_ln_b": jnp.zeros((HIDDEN,), jnp.float32),
        "pool_w": nrm((HIDDEN, HIDDEN)),
        "pool_b": jnp.zeros((HIDDEN,), jnp.float32),
        "layers": [],
    }
    for _ in range(N_LAYERS):
        params["layers"].append({
            "wqkv": nrm((HIDDEN, 3 * HIDDEN)),           # fused Q|K|V projection
            "bqkv": jnp.zeros((3 * HIDDEN,), jnp.float32),
            "wo": nrm((HIDDEN, HIDDEN)), "bo": jnp.zeros((HIDDEN,), jnp.float32),
            "ln1_g": jnp.ones((HIDDEN,), jnp.float32),
            "ln1_b": jnp.zeros((HIDDEN,), jnp.float32),
            "wi": nrm((HIDDEN, INTERMEDIATE)),
            "bi": jnp.zeros((INTERMEDIATE,), jnp.float32),
            "wo2": nrm((INTERMEDIATE, HIDDEN)),
            "bo2": jnp.zeros((HIDDEN,), jnp.float32),
            "ln2_g": jnp.ones((HIDDEN,), jnp.float32),
            "ln2_b": jnp.zeros((HIDDEN,), jnp.float32),
        })
    return params


# ---------------- BertEncoder.forward: returns pooled output (outputs[1]) ----------------
def bert_encoder_forward(params, ids, mask, segment):
    B, S = ids.shape
    H, I = HIDDEN, INTERMEDIATE
    L = len(params["layers"])

    # Embedding lookups stay as XLA gathers (glue); summed embedding is cast to
    # bf16 so the kernel's activation DMA is halved.  LN stats run in f32 in-kernel.
    emb = (jnp.take(params["word_emb"], ids, axis=0)
           + params["pos_emb"][:S][None, :, :]
           + jnp.take(params["type_emb"], segment, axis=0)).astype(jnp.bfloat16)   # (B,S,H)

    # HF-style extended additive mask, kept tiny at (B,1,S); broadcast in-kernel.
    mask_add = ((1.0 - mask.astype(jnp.float32)) * -10000.0)[:, None, :]           # (B,1,S)

    layers = params["layers"]
    stack_w = lambda k: jnp.stack([lp[k] for lp in layers]).astype(jnp.bfloat16)
    stack_v = lambda k: jnp.stack([lp[k] for lp in layers]).astype(jnp.float32)[:, None, :]

    wqkv, wo, wi, wo2 = stack_w("wqkv"), stack_w("wo"), stack_w("wi"), stack_w("wo2")
    bqkv, bo, bi, bo2 = stack_v("bqkv"), stack_v("bo"), stack_v("bi"), stack_v("bo2")
    l1g, l1b = stack_v("ln1_g"), stack_v("ln1_b")
    l2g, l2b = stack_v("ln2_g"), stack_v("ln2_b")

    def full_spec(shape):                       # whole-array operand, same block every step
        return pl.BlockSpec(shape, lambda b, _n=len(shape): (0,) * _n)

    feat = pl.pallas_call(
        partial(_bert_kernel, n_layers=L, n_heads=N_HEADS, head_dim=HEAD_DIM,
                scale=1.0 / math.sqrt(HEAD_DIM), eps=LN_EPS),
        out_shape=jax.ShapeDtypeStruct((B, 1, H), jnp.float32),
        grid=(B,),
        in_specs=[
            pl.BlockSpec((1, S, H), lambda b: (b, 0, 0)),     # summed embeddings
            pl.BlockSpec((1, 1, S), lambda b: (b, 0, 0)),     # additive mask row
            full_spec((1, H)),                                # emb_ln_g
            full_spec((1, H)),                                # emb_ln_b
            full_spec((L, H, 3 * H)),                         # wqkv (bf16)
            full_spec((L, 1, 3 * H)),                         # bqkv
            full_spec((L, H, H)),                             # wo   (bf16)
            full_spec((L, 1, H)),                             # bo
            full_spec((L, 1, H)),                             # ln1_g
            full_spec((L, 1, H)),                             # ln1_b
            full_spec((L, H, I)),                             # wi   (bf16)
            full_spec((L, 1, I)),                             # bi
            full_spec((L, I, H)),                             # wo2  (bf16)
            full_spec((L, 1, H)),                             # bo2
            full_spec((L, 1, H)),                             # ln2_g
            full_spec((L, 1, H)),                             # ln2_b
            full_spec((H, H)),                                # pool_w (bf16)
            full_spec((1, H)),                                # pool_b
        ],
        out_specs=pl.BlockSpec((1, 1, H), lambda b: (b, 0, 0)),
        compiler_params=pltpu.CompilerParams(
            dimension_semantics=("parallel",)),               # >=2 steps -> both v7x TCs busy
    )(emb, mask_add,
      params["emb_ln_g"].reshape(1, H), params["emb_ln_b"].reshape(1, H),
      wqkv, bqkv, wo, bo, l1g, l1b, wi, bi, wo2, bo2, l2g, l2b,
      params["pool_w"].astype(jnp.bfloat16), params["pool_b"].reshape(1, H))

    return feat.reshape(B, H)


if __name__ == "__main__":
    key = jax.random.PRNGKey(0)
    pkey, ikey = jax.random.split(key)
    params = init_params(pkey)

    B, S = 2, 8
    ids = jax.random.randint(ikey, (B, S), 0, VOCAB, dtype=jnp.int32)
    mask = jnp.ones((B, S), jnp.int32).at[1, 6:].set(0)   # pad last 2 tokens of seq 1
    segment = jnp.concatenate(
        [jnp.zeros((B, S // 2), jnp.int32), jnp.ones((B, S // 2), jnp.int32)], axis=1)

    fwd = jax.jit(bert_encoder_forward)
    feat = jax.block_until_ready(fwd(params, ids, mask, segment))
    assert feat.shape == (B, HIDDEN) and feat.dtype == jnp.float32
    assert bool(jnp.all(jnp.isfinite(feat)))
    print("KERNEL_OK")
</pallas_src>

<mosaic_0001>
module attributes {stable_mosaic.version = 11 : i64} {
  func.func @_bert_kernel(%arg0: i32, %arg1: memref<1x8x32xbf16, #tpu.memory_space<vmem>>, %arg2: memref<1x1x8xf32, #tpu.memory_space<vmem>>, %arg3: memref<1x32xf32, #tpu.memory_space<vmem>>, %arg4: memref<1x32xf32, #tpu.memory_space<vmem>>, %arg5: memref<2x32x96xbf16, #tpu.memory_space<vmem>>, %arg6: memref<2x1x96xf32, #tpu.memory_space<vmem>>, %arg7: memref<2x32x32xbf16, #tpu.memory_space<vmem>>, %arg8: memref<2x1x32xf32, #tpu.memory_space<vmem>>, %arg9: memref<2x1x32xf32, #tpu.memory_space<vmem>>, %arg10: memref<2x1x32xf32, #tpu.memory_space<vmem>>, %arg11: memref<2x32x64xbf16, #tpu.memory_space<vmem>>, %arg12: memref<2x1x64xf32, #tpu.memory_space<vmem>>, %arg13: memref<2x64x32xbf16, #tpu.memory_space<vmem>>, %arg14: memref<2x1x32xf32, #tpu.memory_space<vmem>>, %arg15: memref<2x1x32xf32, #tpu.memory_space<vmem>>, %arg16: memref<2x1x32xf32, #tpu.memory_space<vmem>>, %arg17: memref<32x32xbf16, #tpu.memory_space<vmem>>, %arg18: memref<1x32xf32, #tpu.memory_space<vmem>>, %arg19: memref<1x1x32xf32, #tpu.memory_space<vmem>>) attributes {dimension_semantics = [#tpu.dimension_semantics<parallel>], iteration_bounds = array<i64: 2>, scalar_prefetch = 0 : i64, scratch_operands = 0 : i64, tpu.core_type = #tpu.core_type<tc>, window_params = [{transform_indices = @transform_0, window_bounds = array<i64: 1, 8, 32>}, {transform_indices = @transform_1, window_bounds = array<i64: 1, 1, 8>}, {pipeline_mode = #tpu.pipeline_mode<synchronous>, transform_indices = @transform_2, window_bounds = array<i64: 1, 32>}, {pipeline_mode = #tpu.pipeline_mode<synchronous>, transform_indices = @transform_3, window_bounds = array<i64: 1, 32>}, {pipeline_mode = #tpu.pipeline_mode<synchronous>, transform_indices = @transform_4, window_bounds = array<i64: 2, 32, 96>}, {pipeline_mode = #tpu.pipeline_mode<synchronous>, transform_indices = @transform_5, window_bounds = array<i64: 2, 1, 96>}, {pipeline_mode = #tpu.pipeline_mode<synchronous>, transform_indices = @transform_6, window_bounds = array<i64: 2, 32, 32>}, {pipeline_mode = #tpu.pipeline_mode<synchronous>, transform_indices = @transform_7, window_bounds = array<i64: 2, 1, 32>}, {pipeline_mode = #tpu.pipeline_mode<synchronous>, transform_indices = @transform_8, window_bounds = array<i64: 2, 1, 32>}, {pipeline_mode = #tpu.pipeline_mode<synchronous>, transform_indices = @transform_9, window_bounds = array<i64: 2, 1, 32>}, {pipeline_mode = #tpu.pipeline_mode<synchronous>, transform_indices = @transform_10, window_bounds = array<i64: 2, 32, 64>}, {pipeline_mode = #tpu.pipeline_mode<synchronous>, transform_indices = @transform_11, window_bounds = array<i64: 2, 1, 64>}, {pipeline_mode = #tpu.pipeline_mode<synchronous>, transform_indices = @transform_12, window_bounds = array<i64: 2, 64, 32>}, {pipeline_mode = #tpu.pipeline_mode<synchronous>, transform_indices = @transform_13, window_bounds = array<i64: 2, 1, 32>}, {pipeline_mode = #tpu.pipeline_mode<synchronous>, transform_indices = @transform_14, window_bounds = array<i64: 2, 1, 32>}, {pipeline_mode = #tpu.pipeline_mode<synchronous>, transform_indices = @transform_15, window_bounds = array<i64: 2, 1, 32>}, {pipeline_mode = #tpu.pipeline_mode<synchronous>, transform_indices = @transform_16, window_bounds = array<i64: 32, 32>}, {pipeline_mode = #tpu.pipeline_mode<synchronous>, transform_indices = @transform_17, window_bounds = array<i64: 1, 32>}, {transform_indices = @transform_18, window_bounds = array<i64: 1, 1, 32>}]} {
    %c0 = arith.constant 0 : index
    %c0_0 = arith.constant 0 : index
    %c0_1 = arith.constant 0 : index
    %0 = vector.load %arg2[%c0, %c0_0, %c0_1] : memref<1x1x8xf32, #tpu.memory_space<vmem>>, vector<1x1x8xf32>
    %1 = vector.shape_cast %0 : vector<1x1x8xf32> to vector<1x8xf32>
    %c0_2 = arith.constant 0 : index
    %c0_3 = arith.constant 0 : index
    %c0_4 = arith.constant 0 : index
    %2 = vector.load %arg1[%c0_2, %c0_3, %c0_4] : memref<1x8x32xbf16, #tpu.memory_space<vmem>>, vector<1x8x32xbf16>
    %3 = vector.shape_cast %2 : vector<1x8x32xbf16> to vector<8x32xbf16>
    %4 = arith.extf %3 : vector<8x32xbf16> to vector<8x32xf32>
    %c0_5 = arith.constant 0 : index
    %c0_6 = arith.constant 0 : index
    %5 = vector.load %arg3[%c0_5, %c0_6] : memref<1x32xf32, #tpu.memory_space<vmem>>, vector<1x32xf32>
    %c0_7 = arith.constant 0 : index
    %c0_8 = arith.constant 0 : index
    %6 = vector.load %arg4[%c0_7, %c0_8] : memref<1x32xf32, #tpu.memory_space<vmem>>, vector<1x32xf32>
    %cst = arith.constant dense<0.000000e+00> : vector<8xf32>
    %7 = vector.multi_reduction <add>, %4, %cst [1] : vector<8x32xf32> to vector<8xf32>
    %8 = vector.shape_cast %7 : vector<8xf32> to vector<8x1xf32>
    %cst_9 = arith.constant 3.200000e+01 : f32
    %9 = vector.broadcast %cst_9 : f32 to vector<8x1xf32>
    %10 = arith.divf %8, %9 : vector<8x1xf32>
    %11 = vector.broadcast %10 : vector<8x1xf32> to vector<8x32xf32>
    %12 = arith.subf %4, %11 : vector<8x32xf32>
    %13 = arith.mulf %12, %12 : vector<8x32xf32>
    %cst_10 = arith.constant dense<0.000000e+00> : vector<8xf32>
    %14 = vector.multi_reduction <add>, %13, %cst_10 [1] : vector<8x32xf32> to vector<8xf32>
    %15 = vector.shape_cast %14 : vector<8xf32> to vector<8x1xf32>
    %cst_11 = arith.constant 3.200000e+01 : f32
    %16 = vector.broadcast %cst_11 : f32 to vector<8x1xf32>
    %17 = arith.divf %15, %16 : vector<8x1xf32>
    %18 = vector.broadcast %10 : vector<8x1xf32> to vector<8x32xf32>
    %19 = arith.subf %4, %18 : vector<8x32xf32>
    %cst_12 = arith.constant 9.99999996E-13 : f32
    %20 = vector.broadcast %cst_12 : f32 to vector<8x1xf32>
    %21 = arith.addf %17, %20 : vector<8x1xf32>
    %22 = math.rsqrt %21 : vector<8x1xf32>
    %23 = vector.broadcast %22 : vector<8x1xf32> to vector<8x32xf32>
    %24 = arith.mulf %19, %23 : vector<8x32xf32>
    %25 = vector.broadcast %5 : vector<1x32xf32> to vector<8x32xf32>
    %26 = arith.mulf %24, %25 : vector<8x32xf32>
    %27 = vector.broadcast %6 : vector<1x32xf32> to vector<8x32xf32>
    %28 = arith.addf %26, %27 : vector<8x32xf32>
    %29 = arith.truncf %28 : vector<8x32xf32> to vector<8x32xbf16>
    %c0_13 = arith.constant 0 : index
    %c0_14 = arith.constant 0 : index
    %c0_15 = arith.constant 0 : index
    %30 = vector.load %arg5[%c0_13, %c0_14, %c0_15] : memref<2x32x96xbf16, #tpu.memory_space<vmem>>, vector<1x32x96xbf16>
    %31 = vector.shape_cast %30 : vector<1x32x96xbf16> to vector<32x96xbf16>
    %cst_16 = arith.constant dense<0.000000e+00> : vector<8x96xf32>
    %32 = tpu.matmul %29, %31, %cst_16 {dimension_numbers = #tpu.dot_dimension_numbers<[1], [0], [0], [1], [0, 0, 1, 1], [], []>} : vector<8x32xbf16>, vector<32x96xbf16>, vector<8x96xf32> -> vector<8x96xf32>
    %c0_17 = arith.constant 0 : index
    %c0_18 = arith.constant 0 : index
    %c0_19 = arith.constant 0 : index
    %33 = vector.load %arg6[%c0_17, %c0_18, %c0_19] : memref<2x1x96xf32, #tpu.memory_space<vmem>>, vector<1x1x96xf32>
    %34 = vector.shape_cast %33 : vector<1x1x96xf32> to vector<1x96xf32>
    %35 = vector.broadcast %34 : vector<1x96xf32> to vector<8x96xf32>
    %36 = arith.addf %32, %35 : vector<8x96xf32>
    %37 = vector.extract_strided_slice %36 {offsets = [0, 0], sizes = [8, 16], strides = [1, 1]} : vector<8x96xf32> to vector<8x16xf32>
    %38 = arith.truncf %37 : vector<8x16xf32> to vector<8x16xbf16>
    %39 = vector.extract_strided_slice %36 {offsets = [0, 32], sizes = [8, 16], strides = [1, 1]} : vector<8x96xf32> to vector<8x16xf32>
    %40 = arith.truncf %39 : vector<8x16xf32> to vector<8x16xbf16>
    %41 = vector.extract_strided_slice %36 {offsets = [0, 64], sizes = [8, 16], strides = [1, 1]} : vector<8x96xf32> to vector<8x16xf32>
    %42 = arith.truncf %41 : vector<8x16xf32> to vector<8x16xbf16>
    %cst_20 = arith.constant dense<0.000000e+00> : vector<8x8xf32>
    %43 = tpu.matmul %38, %40, %cst_20 {dimension_numbers = #tpu.dot_dimension_numbers<[1], [1], [0], [0], [0, 0, 1, 0], [], []>} : vector<8x16xbf16>, vector<8x16xbf16>, vector<8x8xf32> -> vector<8x8xf32>
    %cst_21 = arith.constant 2.500000e-01 : f32
    %44 = vector.broadcast %cst_21 : f32 to vector<8x8xf32>
    %45 = arith.mulf %43, %44 : vector<8x8xf32>
    %46 = vector.broadcast %1 : vector<1x8xf32> to vector<8x8xf32>
    %47 = arith.addf %45, %46 : vector<8x8xf32>
    %cst_22 = arith.constant dense<0xFF800000> : vector<8xf32>
    %48 = vector.multi_reduction <maximumf>, %47, %cst_22 [1] : vector<8x8xf32> to vector<8xf32>
    %49 = vector.shape_cast %48 : vector<8xf32> to vector<8x1xf32>
    %50 = vector.broadcast %49 : vector<8x1xf32> to vector<8x8xf32>
    %51 = arith.subf %47, %50 : vector<8x8xf32>
    %52 = math.exp %51 : vector<8x8xf32>
    %cst_23 = arith.constant dense<0.000000e+00> : vector<8xf32>
    %53 = vector.multi_reduction <add>, %52, %cst_23 [1] : vector<8x8xf32> to vector<8xf32>
    %54 = vector.shape_cast %53 : vector<8xf32> to vector<8x1xf32>
    %55 = vector.broadcast %54 : vector<8x1xf32> to vector<8x8xf32>
    %56 = arith.divf %52, %55 : vector<8x8xf32>
    %57 = arith.truncf %56 : vector<8x8xf32> to vector<8x8xbf16>
    %cst_24 = arith.constant dense<0.000000e+00> : vector<8x16xf32>
    %58 = tpu.matmul %57, %42, %cst_24 {dimension_numbers = #tpu.dot_dimension_numbers<[1], [0], [0], [1], [0, 0, 1, 1], [], []>} : vector<8x8xbf16>, vector<8x16xbf16>, vector<8x16xf32> -> vector<8x16xf32>
    %59 = vector.extract_strided_slice %36 {offsets = [0, 16], sizes = [8, 16], strides = [1, 1]} : vector<8x96xf32> to vector<8x16xf32>
    %60 = arith.truncf %59 : vector<8x16xf32> to vector<8x16xbf16>
    %61 = vector.extract_strided_slice %36 {offsets = [0, 48], sizes = [8, 16], strides = [1, 1]} : vector<8x96xf32> to vector<8x16xf32>
    %62 = arith.truncf %61 : vector<8x16xf32> to vector<8x16xbf16>
    %63 = vector.extract_strided_slice %36 {offsets = [0, 80], sizes = [8, 16], strides = [1, 1]} : vector<8x96xf32> to vector<8x16xf32>
    %64 = arith.truncf %63 : vector<8x16xf32> to vector<8x16xbf16>
    %cst_25 = arith.constant dense<0.000000e+00> : vector<8x8xf32>
    %65 = tpu.matmul %60, %62, %cst_25 {dimension_numbers = #tpu.dot_dimension_numbers<[1], [1], [0], [0], [0, 0, 1, 0], [], []>} : vector<8x16xbf16>, vector<8x16xbf16>, vector<8x8xf32> -> vector<8x8xf32>
    %cst_26 = arith.constant 2.500000e-01 : f32
    %66 = vector.broadcast %cst_26 : f32 to vector<8x8xf32>
    %67 = arith.mulf %65, %66 : vector<8x8xf32>
    %68 = vector.broadcast %1 : vector<1x8xf32> to vector<8x8xf32>
    %69 = arith.addf %67, %68 : vector<8x8xf32>
    %cst_27 = arith.constant dense<0xFF800000> : vector<8xf32>
    %70 = vector.multi_reduction <maximumf>, %69, %cst_27 [1] : vector<8x8xf32> to vector<8xf32>
    %71 = vector.shape_cast %70 : vector<8xf32> to vector<8x1xf32>
    %72 = vector.broadcast %71 : vector<8x1xf32> to vector<8x8xf32>
    %73 = arith.subf %69, %72 : vector<8x8xf32>
    %74 = math.exp %73 : vector<8x8xf32>
    %cst_28 = arith.constant dense<0.000000e+00> : vector<8xf32>
    %75 = vector.multi_reduction <add>, %74, %cst_28 [1] : vector<8x8xf32> to vector<8xf32>
    %76 = vector.shape_cast %75 : vector<8xf32> to vector<8x1xf32>
    %77 = vector.broadcast %76 : vector<8x1xf32> to vector<8x8xf32>
    %78 = arith.divf %74, %77 : vector<8x8xf32>
    %79 = arith.truncf %78 : vector<8x8xf32> to vector<8x8xbf16>
    %cst_29 = arith.constant dense<0.000000e+00> : vector<8x16xf32>
    %80 = tpu.matmul %79, %64, %cst_29 {dimension_numbers = #tpu.dot_dimension_numbers<[1], [0], [0], [1], [0, 0, 1, 1], [], []>} : vector<8x8xbf16>, vector<8x16xbf16>, vector<8x16xf32> -> vector<8x16xf32>
    %81 = tpu.concatenate %58, %80 in 1 : vector<8x16xf32>, vector<8x16xf32> -> vector<8x32xf32>
    %82 = arith.truncf %81 : vector<8x32xf32> to vector<8x32xbf16>
    %c0_30 = arith.constant 0 : index
    %c0_31 = arith.constant 0 : index
    %c0_32 = arith.constant 0 : index
    %83 = vector.load %arg7[%c0_30, %c0_31, %c0_32] : memref<2x32x32xbf16, #tpu.memory_space<vmem>>, vector<1x32x32xbf16>
    %84 = vector.shape_cast %83 : vector<1x32x32xbf16> to vector<32x32xbf16>
    %cst_33 = arith.constant dense<0.000000e+00> : vector<8x32xf32>
    %85 = tpu.matmul %82, %84, %cst_33 {dimension_numbers = #tpu.dot_dimension_numbers<[1], [0], [0], [1], [0, 0, 1, 1], [], []>} : vector<8x32xbf16>, vector<32x32xbf16>, vector<8x32xf32> -> vector<8x32xf32>
    %c0_34 = arith.constant 0 : index
    %c0_35 = arith.constant 0 : index
    %c0_36 = arith.constant 0 : index
    %86 = vector.load %arg8[%c0_34, %c0_35, %c0_36] : memref<2x1x32xf32, #tpu.memory_space<vmem>>, vector<1x1x32xf32>
    %87 = vector.shape_cast %86 : vector<1x1x32xf32> to vector<1x32xf32>
    %88 = vector.broadcast %87 : vector<1x32xf32> to vector<8x32xf32>
    %89 = arith.addf %85, %88 : vector<8x32xf32>
    %90 = arith.addf %89, %28 : vector<8x32xf32>
    %c0_37 = arith.constant 0 : index
    %c0_38 = arith.constant 0 : index
    %c0_39 = arith.constant 0 : index
    %91 = vector.load %arg9[%c0_37, %c0_38, %c0_39] : memref<2x1x32xf32, #tpu.memory_space<vmem>>, vector<1x1x32xf32>
    %92 = vector.shape_cast %91 : vector<1x1x32xf32> to vector<1x32xf32>
    %c0_40 = arith.constant 0 : index
    %c0_41 = arith.constant 0 : index
    %c0_42 = arith.constant 0 : index
    %93 = vector.load %arg10[%c0_40, %c0_41, %c0_42] : memref<2x1x32xf32, #tpu.memory_space<vmem>>, vector<1x1x32xf32>
    %94 = vector.shape_cast %93 : vector<1x1x32xf32> to vector<1x32xf32>
    %cst_43 = arith.constant dense<0.000000e+00> : vector<8xf32>
    %95 = vector.multi_reduction <add>, %90, %cst_43 [1] : vector<8x32xf32> to vector<8xf32>
    %96 = vector.shape_cast %95 : vector<8xf32> to vector<8x1xf32>
    %cst_44 = arith.constant 3.200000e+01 : f32
    %97 = vector.broadcast %cst_44 : f32 to vector<8x1xf32>
    %98 = arith.divf %96, %97 : vector<8x1xf32>
    %99 = vector.broadcast %98 : vector<8x1xf32> to vector<8x32xf32>
    %100 = arith.subf %90, %99 : vector<8x32xf32>
    %101 = arith.mulf %100, %100 : vector<8x32xf32>
    %cst_45 = arith.constant dense<0.000000e+00> : vector<8xf32>
    %102 = vector.multi_reduction <add>, %101, %cst_45 [1] : vector<8x32xf32> to vector<8xf32>
    %103 = vector.shape_cast %102 : vector<8xf32> to vector<8x1xf32>
    %cst_46 = arith.constant 3.200000e+01 : f32
    %104 = vector.broadcast %cst_46 : f32 to vector<8x1xf32>
    %105 = arith.divf %103, %104 : vector<8x1xf32>
    %106 = vector.broadcast %98 : vector<8x1xf32> to vector<8x32xf32>
    %107 = arith.subf %90, %106 : vector<8x32xf32>
    %cst_47 = arith.constant 9.99999996E-13 : f32
    %108 = vector.broadcast %cst_47 : f32 to vector<8x1xf32>
    %109 = arith.addf %105, %108 : vector<8x1xf32>
    %110 = math.rsqrt %109 : vector<8x1xf32>
    %111 = vector.broadcast %110 : vector<8x1xf32> to vector<8x32xf32>
    %112 = arith.mulf %107, %111 : vector<8x32xf32>
    %113 = vector.broadcast %92 : vector<1x32xf32> to vector<8x32xf32>
    %114 = arith.mulf %112, %113 : vector<8x32xf32>
    %115 = vector.broadcast %94 : vector<1x32xf32> to vector<8x32xf32>
    %116 = arith.addf %114, %115 : vector<8x32xf32>
    %117 = arith.truncf %116 : vector<8x32xf32> to vector<8x32xbf16>
    %c0_48 = arith.constant 0 : index
    %c0_49 = arith.constant 0 : index
    %c0_50 = arith.constant 0 : index
    %118 = vector.load %arg11[%c0_48, %c0_49, %c0_50] : memref<2x32x64xbf16, #tpu.memory_space<vmem>>, vector<1x32x64xbf16>
    %119 = vector.shape_cast %118 : vector<1x32x64xbf16> to vector<32x64xbf16>
    %cst_51 = arith.constant dense<0.000000e+00> : vector<8x64xf32>
    %120 = tpu.matmul %117, %119, %cst_51 {dimension_numbers = #tpu.dot_dimension_numbers<[1], [0], [0], [1], [0, 0, 1, 1], [], []>} : vector<8x32xbf16>, vector<32x64xbf16>, vector<8x64xf32> -> vector<8x64xf32>
    %c0_52 = arith.constant 0 : index
    %c0_53 = arith.constant 0 : index
    %c0_54 = arith.constant 0 : index
    %121 = vector.load %arg12[%c0_52, %c0_53, %c0_54] : memref<2x1x64xf32, #tpu.memory_space<vmem>>, vector<1x1x64xf32>
    %122 = vector.shape_cast %121 : vector<1x1x64xf32> to vector<1x64xf32>
    %123 = vector.broadcast %122 : vector<1x64xf32> to vector<8x64xf32>
    %124 = arith.addf %120, %123 : vector<8x64xf32>
    %cst_55 = arith.constant 5.000000e-01 : f32
    %125 = vector.broadcast %cst_55 : f32 to vector<8x64xf32>
    %126 = arith.mulf %125, %124 : vector<8x64xf32>
    %cst_56 = arith.constant 0.707106769 : f32
    %127 = vector.broadcast %cst_56 : f32 to vector<8x64xf32>
    %128 = arith.mulf %124, %127 : vector<8x64xf32>
    %129 = math.absf %128 : vector<8x64xf32>
    %cst_57 = arith.constant 0.327591091 : f32
    %130 = vector.broadcast %cst_57 : f32 to vector<8x64xf32>
    %131 = arith.mulf %130, %129 : vector<8x64xf32>
    %cst_58 = arith.constant 1.000000e+00 : f32
    %132 = vector.broadcast %cst_58 : f32 to vector<8x64xf32>
    %133 = arith.addf %132, %131 : vector<8x64xf32>
    %cst_59 = arith.constant 1.000000e+00 : f32
    %134 = vector.broadcast %cst_59 : f32 to vector<8x64xf32>
    %135 = arith.divf %134, %133 : vector<8x64xf32>
    %cst_60 = arith.constant 1.06140542 : f32
    %136 = vector.broadcast %cst_60 : f32 to vector<8x64xf32>
    %137 = arith.mulf %135, %136 : vector<8x64xf32>
    %cst_61 = arith.constant -1.45315206 : f32
    %138 = vector.broadcast %cst_61 : f32 to vector<8x64xf32>
    %139 = arith.addf %138, %137 : vector<8x64xf32>
    %140 = arith.mulf %135, %139 : vector<8x64xf32>
    %cst_62 = arith.constant 1.42141378 : f32
    %141 = vector.broadcast %cst_62 : f32 to vector<8x64xf32>
    %142 = arith.addf %141, %140 : vector<8x64xf32>
    %143 = arith.mulf %135, %142 : vector<8x64xf32>
    %cst_63 = arith.constant -0.284496725 : f32
    %144 = vector.broadcast %cst_63 : f32 to vector<8x64xf32>
    %145 = arith.addf %144, %143 : vector<8x64xf32>
    %146 = arith.mulf %135, %145 : vector<8x64xf32>
    %cst_64 = arith.constant 0.254829586 : f32
    %147 = vector.broadcast %cst_64 : f32 to vector<8x64xf32>
    %148 = arith.addf %147, %146 : vector<8x64xf32>
    %149 = arith.mulf %135, %148 : vector<8x64xf32>
    %cst_65 = arith.constant 0.000000e+00 : f32
    %150 = vector.broadcast %cst_65 : f32 to vector<8x64xf32>
    %151 = arith.subf %150, %128 : vector<8x64xf32>
    %152 = arith.mulf %151, %128 : vector<8x64xf32>
    %153 = math.exp %152 : vector<8x64xf32>
    %154 = arith.mulf %149, %153 : vector<8x64xf32>
    %cst_66 = arith.constant 1.000000e+00 : f32
    %155 = vector.broadcast %cst_66 : f32 to vector<8x64xf32>
    %156 = arith.subf %155, %154 : vector<8x64xf32>
    %cst_67 = arith.constant 0.000000e+00 : f32
    %157 = vector.broadcast %cst_67 : f32 to vector<8x64xf32>
    %158 = arith.cmpf oge, %128, %157 : vector<8x64xf32>
    %cst_68 = arith.constant 0.000000e+00 : f32
    %159 = vector.broadcast %cst_68 : f32 to vector<8x64xf32>
    %160 = arith.subf %159, %156 : vector<8x64xf32>
    %161 = arith.select %158, %156, %160 : vector<8x64xi1>, vector<8x64xf32>
    %cst_69 = arith.constant 1.000000e+00 : f32
    %162 = vector.broadcast %cst_69 : f32 to vector<8x64xf32>
    %163 = arith.addf %162, %161 : vector<8x64xf32>
    %164 = arith.mulf %126, %163 : vector<8x64xf32>
    %165 = arith.truncf %164 : vector<8x64xf32> to vector<8x64xbf16>
    %c0_70 = arith.constant 0 : index
    %c0_71 = arith.constant 0 : index
    %c0_72 = arith.constant 0 : index
    %166 = vector.load %arg13[%c0_70, %c0_71, %c0_72] : memref<2x64x32xbf16, #tpu.memory_space<vmem>>, vector<1x64x32xbf16>
    %167 = vector.shape_cast %166 : vector<1x64x32xbf16> to vector<64x32xbf16>
    %cst_73 = arith.constant dense<0.000000e+00> : vector<8x32xf32>
    %168 = tpu.matmul %165, %167, %cst_73 {dimension_numbers = #tpu.dot_dimension_numbers<[1], [0], [0], [1], [0, 0, 1, 1], [], []>} : vector<8x64xbf16>, vector<64x32xbf16>, vector<8x32xf32> -> vector<8x32xf32>
    %c0_74 = arith.constant 0 : index
    %c0_75 = arith.constant 0 : index
    %c0_76 = arith.constant 0 : index
    %169 = vector.load %arg14[%c0_74, %c0_75, %c0_76] : memref<2x1x32xf32, #tpu.memory_space<vmem>>, vector<1x1x32xf32>
    %170 = vector.shape_cast %169 : vector<1x1x32xf32> to vector<1x32xf32>
    %171 = vector.broadcast %170 : vector<1x32xf32> to vector<8x32xf32>
    %172 = arith.addf %168, %171 : vector<8x32xf32>
    %173 = arith.addf %172, %116 : vector<8x32xf32>
    %c0_77 = arith.constant 0 : index
    %c0_78 = arith.constant 0 : index
    %c0_79 = arith.constant 0 : index
    %174 = vector.load %arg15[%c0_77, %c0_78, %c0_79] : memref<2x1x32xf32, #tpu.memory_space<vmem>>, vector<1x1x32xf32>
    %175 = vector.shape_cast %174 : vector<1x1x32xf32> to vector<1x32xf32>
    %c0_80 = arith.constant 0 : index
    %c0_81 = arith.constant 0 : index
    %c0_82 = arith.constant 0 : index
    %176 = vector.load %arg16[%c0_80, %c0_81, %c0_82] : memref<2x1x32xf32, #tpu.memory_space<vmem>>, vector<1x1x32xf32>
    %177 = vector.shape_cast %176 : vector<1x1x32xf32> to vector<1x32xf32>
    %cst_83 = arith.constant dense<0.000000e+00> : vector<8xf32>
    %178 = vector.multi_reduction <add>, %173, %cst_83 [1] : vector<8x32xf32> to vector<8xf32>
    %179 = vector.shape_cast %178 : vector<8xf32> to vector<8x1xf32>
    %cst_84 = arith.constant 3.200000e+01 : f32
    %180 = vector.broadcast %cst_84 : f32 to vector<8x1xf32>
    %181 = arith.divf %179, %180 : vector<8x1xf32>
    %182 = vector.broadcast %181 : vector<8x1xf32> to vector<8x32xf32>
    %183 = arith.subf %173, %182 : vector<8x32xf32>
    %184 = arith.mulf %183, %183 : vector<8x32xf32>
    %cst_85 = arith.constant dense<0.000000e+00> : vector<8xf32>
    %185 = vector.multi_reduction <add>, %184, %cst_85 [1] : vector<8x32xf32> to vector<8xf32>
    %186 = vector.shape_cast %185 : vector<8xf32> to vector<8x1xf32>
    %cst_86 = arith.constant 3.200000e+01 : f32
    %187 = vector.broadcast %cst_86 : f32 to vector<8x1xf32>
    %188 = arith.divf %186, %187 : vector<8x1xf32>
    %189 = vector.broadcast %181 : vector<8x1xf32> to vector<8x32xf32>
    %190 = arith.subf %173, %189 : vector<8x32xf32>
    %cst_87 = arith.constant 9.99999996E-13 : f32
    %191 = vector.broadcast %cst_87 : f32 to vector<8x1xf32>
    %192 = arith.addf %188, %191 : vector<8x1xf32>
    %193 = math.rsqrt %192 : vector<8x1xf32>
    %194 = vector.broadcast %193 : vector<8x1xf32> to vector<8x32xf32>
    %195 = arith.mulf %190, %194 : vector<8x32xf32>
    %196 = vector.broadcast %175 : vector<1x32xf32> to vector<8x32xf32>
    %197 = arith.mulf %195, %196 : vector<8x32xf32>
    %198 = vector.broadcast %177 : vector<1x32xf32> to vector<8x32xf32>
    %199 = arith.addf %197, %198 : vector<8x32xf32>
    %200 = arith.truncf %199 : vector<8x32xf32> to vector<8x32xbf16>
    %c1 = arith.constant 1 : index
    %c0_88 = arith.constant 0 : index
    %c0_89 = arith.constant 0 : index
    %201 = vector.load %arg5[%c1, %c0_88, %c0_89] : memref<2x32x96xbf16, #tpu.memory_space<vmem>>, vector<1x32x96xbf16>
    %202 = vector.shape_cast %201 : vector<1x32x96xbf16> to vector<32x96xbf16>
    %cst_90 = arith.constant dense<0.000000e+00> : vector<8x96xf32>
    %203 = tpu.matmul %200, %202, %cst_90 {dimension_numbers = #tpu.dot_dimension_numbers<[1], [0], [0], [1], [0, 0, 1, 1], [], []>} : vector<8x32xbf16>, vector<32x96xbf16>, vector<8x96xf32> -> vector<8x96xf32>
    %c1_91 = arith.constant 1 : index
    %c0_92 = arith.constant 0 : index
    %c0_93 = arith.constant 0 : index
    %204 = vector.load %arg6[%c1_91, %c0_92, %c0_93] : memref<2x1x96xf32, #tpu.memory_space<vmem>>, vector<1x1x96xf32>
    %205 = vector.shape_cast %204 : vector<1x1x96xf32> to vector<1x96xf32>
    %206 = vector.broadcast %205 : vector<1x96xf32> to vector<8x96xf32>
    %207 = arith.addf %203, %206 : vector<8x96xf32>
    %208 = vector.extract_strided_slice %207 {offsets = [0, 0], sizes = [8, 16], strides = [1, 1]} : vector<8x96xf32> to vector<8x16xf32>
    %209 = arith.truncf %208 : vector<8x16xf32> to vector<8x16xbf16>
    %210 = vector.extract_strided_slice %207 {offsets = [0, 32], sizes = [8, 16], strides = [1, 1]} : vector<8x96xf32> to vector<8x16xf32>
    %211 = arith.truncf %210 : vector<8x16xf32> to vector<8x16xbf16>
    %212 = vector.extract_strided_slice %207 {offsets = [0, 64], sizes = [8, 16], strides = [1, 1]} : vector<8x96xf32> to vector<8x16xf32>
    %213 = arith.truncf %212 : vector<8x16xf32> to vector<8x16xbf16>
    %cst_94 = arith.constant dense<0.000000e+00> : vector<8x8xf32>
    %214 = tpu.matmul %209, %211, %cst_94 {dimension_numbers = #tpu.dot_dimension_numbers<[1], [1], [0], [0], [0, 0, 1, 0], [], []>} : vector<8x16xbf16>, vector<8x16xbf16>, vector<8x8xf32> -> vector<8x8xf32>
    %cst_95 = arith.constant 2.500000e-01 : f32
    %215 = vector.broadcast %cst_95 : f32 to vector<8x8xf32>
    %216 = arith.mulf %214, %215 : vector<8x8xf32>
    %217 = vector.broadcast %1 : vector<1x8xf32> to vector<8x8xf32>
    %218 = arith.addf %216, %217 : vector<8x8xf32>
    %cst_96 = arith.constant dense<0xFF800000> : vector<8xf32>
    %219 = vector.multi_reduction <maximumf>, %218, %cst_96 [1] : vector<8x8xf32> to vector<8xf32>
    %220 = vector.shape_cast %219 : vector<8xf32> to vector<8x1xf32>
    %221 = vector.broadcast %220 : vector<8x1xf32> to vector<8x8xf32>
    %222 = arith.subf %218, %221 : vector<8x8xf32>
    %223 = math.exp %222 : vector<8x8xf32>
    %cst_97 = arith.constant dense<0.000000e+00> : vector<8xf32>
    %224 = vector.multi_reduction <add>, %223, %cst_97 [1] : vector<8x8xf32> to vector<8xf32>
    %225 = vector.shape_cast %224 : vector<8xf32> to vector<8x1xf32>
    %226 = vector.broadcast %225 : vector<8x1xf32> to vector<8x8xf32>
    %227 = arith.divf %223, %226 : vector<8x8xf32>
    %228 = arith.truncf %227 : vector<8x8xf32> to vector<8x8xbf16>
    %cst_98 = arith.constant dense<0.000000e+00> : vector<8x16xf32>
    %229 = tpu.matmul %228, %213, %cst_98 {dimension_numbers = #tpu.dot_dimension_numbers<[1], [0], [0], [1], [0, 0, 1, 1], [], []>} : vector<8x8xbf16>, vector<8x16xbf16>, vector<8x16xf32> -> vector<8x16xf32>
    %230 = vector.extract_strided_slice %207 {offsets = [0, 16], sizes = [8, 16], strides = [1, 1]} : vector<8x96xf32> to vector<8x16xf32>
    %231 = arith.truncf %230 : vector<8x16xf32> to vector<8x16xbf16>
    %232 = vector.extract_strided_slice %207 {offsets = [0, 48], sizes = [8, 16], strides = [1, 1]} : vector<8x96xf32> to vector<8x16xf32>
    %233 = arith.truncf %232 : vector<8x16xf32> to vector<8x16xbf16>
    %234 = vector.extract_strided_slice %207 {offsets = [0, 80], sizes = [8, 16], strides = [1, 1]} : vector<8x96xf32> to vector<8x16xf32>
    %235 = arith.truncf %234 : vector<8x16xf32> to vector<8x16xbf16>
    %cst_99 = arith.constant dense<0.000000e+00> : vector<8x8xf32>
    %236 = tpu.matmul %231, %233, %cst_99 {dimension_numbers = #tpu.dot_dimension_numbers<[1], [1], [0], [0], [0, 0, 1, 0], [], []>} : vector<8x16xbf16>, vector<8x16xbf16>, vector<8x8xf32> -> vector<8x8xf32>
    %cst_100 = arith.constant 2.500000e-01 : f32
    %237 = vector.broadcast %cst_100 : f32 to vector<8x8xf32>
    %238 = arith.mulf %236, %237 : vector<8x8xf32>
    %239 = vector.broadcast %1 : vector<1x8xf32> to vector<8x8xf32>
    %240 = arith.addf %238, %239 : vector<8x8xf32>
    %cst_101 = arith.constant dense<0xFF800000> : vector<8xf32>
    %241 = vector.multi_reduction <maximumf>, %240, %cst_101 [1] : vector<8x8xf32> to vector<8xf32>
    %242 = vector.shape_cast %241 : vector<8xf32> to vector<8x1xf32>
    %243 = vector.broadcast %242 : vector<8x1xf32> to vector<8x8xf32>
    %244 = arith.subf %240, %243 : vector<8x8xf32>
    %245 = math.exp %244 : vector<8x8xf32>
    %cst_102 = arith.constant dense<0.000000e+00> : vector<8xf32>
    %246 = vector.multi_reduction <add>, %245, %cst_102 [1] : vector<8x8xf32> to vector<8xf32>
    %247 = vector.shape_cast %246 : vector<8xf32> to vector<8x1xf32>
    %248 = vector.broadcast %247 : vector<8x1xf32> to vector<8x8xf32>
    %249 = arith.divf %245, %248 : vector<8x8xf32>
    %250 = arith.truncf %249 : vector<8x8xf32> to vector<8x8xbf16>
    %cst_103 = arith.constant dense<0.000000e+00> : vector<8x16xf32>
    %251 = tpu.matmul %250, %235, %cst_103 {dimension_numbers = #tpu.dot_dimension_numbers<[1], [0], [0], [1], [0, 0, 1, 1], [], []>} : vector<8x8xbf16>, vector<8x16xbf16>, vector<8x16xf32> -> vector<8x16xf32>
    %252 = tpu.concatenate %229, %251 in 1 : vector<8x16xf32>, vector<8x16xf32> -> vector<8x32xf32>
    %253 = arith.truncf %252 : vector<8x32xf32> to vector<8x32xbf16>
    %c1_104 = arith.constant 1 : index
    %c0_105 = arith.constant 0 : index
    %c0_106 = arith.constant 0 : index
    %254 = vector.load %arg7[%c1_104, %c0_105, %c0_106] : memref<2x32x32xbf16, #tpu.memory_space<vmem>>, vector<1x32x32xbf16>
    %255 = vector.shape_cast %254 : vector<1x32x32xbf16> to vector<32x32xbf16>
    %cst_107 = arith.constant dense<0.000000e+00> : vector<8x32xf32>
    %256 = tpu.matmul %253, %255, %cst_107 {dimension_numbers = #tpu.dot_dimension_numbers<[1], [0], [0], [1], [0, 0, 1, 1], [], []>} : vector<8x32xbf16>, vector<32x32xbf16>, vector<8x32xf32> -> vector<8x32xf32>
    %c1_108 = arith.constant 1 : index
    %c0_109 = arith.constant 0 : index
    %c0_110 = arith.constant 0 : index
    %257 = vector.load %arg8[%c1_108, %c0_109, %c0_110] : memref<2x1x32xf32, #tpu.memory_space<vmem>>, vector<1x1x32xf32>
    %258 = vector.shape_cast %257 : vector<1x1x32xf32> to vector<1x32xf32>
    %259 = vector.broadcast %258 : vector<1x32xf32> to vector<8x32xf32>
    %260 = arith.addf %256, %259 : vector<8x32xf32>
    %261 = arith.addf %260, %199 : vector<8x32xf32>
    %c1_111 = arith.constant 1 : index
    %c0_112 = arith.constant 0 : index
    %c0_113 = arith.constant 0 : index
    %262 = vector.load %arg9[%c1_111, %c0_112, %c0_113] : memref<2x1x32xf32, #tpu.memory_space<vmem>>, vector<1x1x32xf32>
    %263 = vector.shape_cast %262 : vector<1x1x32xf32> to vector<1x32xf32>
    %c1_114 = arith.constant 1 : index
    %c0_115 = arith.constant 0 : index
    %c0_116 = arith.constant 0 : index
    %264 = vector.load %arg10[%c1_114, %c0_115, %c0_116] : memref<2x1x32xf32, #tpu.memory_space<vmem>>, vector<1x1x32xf32>
    %265 = vector.shape_cast %264 : vector<1x1x32xf32> to vector<1x32xf32>
    %cst_117 = arith.constant dense<0.000000e+00> : vector<8xf32>
    %266 = vector.multi_reduction <add>, %261, %cst_117 [1] : vector<8x32xf32> to vector<8xf32>
    %267 = vector.shape_cast %266 : vector<8xf32> to vector<8x1xf32>
    %cst_118 = arith.constant 3.200000e+01 : f32
    %268 = vector.broadcast %cst_118 : f32 to vector<8x1xf32>
    %269 = arith.divf %267, %268 : vector<8x1xf32>
    %270 = vector.broadcast %269 : vector<8x1xf32> to vector<8x32xf32>
    %271 = arith.subf %261, %270 : vector<8x32xf32>
    %272 = arith.mulf %271, %271 : vector<8x32xf32>
    %cst_119 = arith.constant dense<0.000000e+00> : vector<8xf32>
    %273 = vector.multi_reduction <add>, %272, %cst_119 [1] : vector<8x32xf32> to vector<8xf32>
    %274 = vector.shape_cast %273 : vector<8xf32> to vector<8x1xf32>
    %cst_120 = arith.constant 3.200000e+01 : f32
    %275 = vector.broadcast %cst_120 : f32 to vector<8x1xf32>
    %276 = arith.divf %274, %275 : vector<8x1xf32>
    %277 = vector.broadcast %269 : vector<8x1xf32> to vector<8x32xf32>
    %278 = arith.subf %261, %277 : vector<8x32xf32>
    %cst_121 = arith.constant 9.99999996E-13 : f32
    %279 = vector.broadcast %cst_121 : f32 to vector<8x1xf32>
    %280 = arith.addf %276, %279 : vector<8x1xf32>
    %281 = math.rsqrt %280 : vector<8x1xf32>
    %282 = vector.broadcast %281 : vector<8x1xf32> to vector<8x32xf32>
    %283 = arith.mulf %278, %282 : vector<8x32xf32>
    %284 = vector.broadcast %263 : vector<1x32xf32> to vector<8x32xf32>
    %285 = arith.mulf %283, %284 : vector<8x32xf32>
    %286 = vector.broadcast %265 : vector<1x32xf32> to vector<8x32xf32>
    %287 = arith.addf %285, %286 : vector<8x32xf32>
    %288 = arith.truncf %287 : vector<8x32xf32> to vector<8x32xbf16>
    %c1_122 = arith.constant 1 : index
    %c0_123 = arith.constant 0 : index
    %c0_124 = arith.constant 0 : index
    %289 = vector.load %arg11[%c1_122, %c0_123, %c0_124] : memref<2x32x64xbf16, #tpu.memory_space<vmem>>, vector<1x32x64xbf16>
    %290 = vector.shape_cast %289 : vector<1x32x64xbf16> to vector<32x64xbf16>
    %cst_125 = arith.constant dense<0.000000e+00> : vector<8x64xf32>
    %291 = tpu.matmul %288, %290, %cst_125 {dimension_numbers = #tpu.dot_dimension_numbers<[1], [0], [0], [1], [0, 0, 1, 1], [], []>} : vector<8x32xbf16>, vector<32x64xbf16>, vector<8x64xf32> -> vector<8x64xf32>
    %c1_126 = arith.constant 1 : index
    %c0_127 = arith.constant 0 : index
    %c0_128 = arith.constant 0 : index
    %292 = vector.load %arg12[%c1_126, %c0_127, %c0_128] : memref<2x1x64xf32, #tpu.memory_space<vmem>>, vector<1x1x64xf32>
    %293 = vector.shape_cast %292 : vector<1x1x64xf32> to vector<1x64xf32>
    %294 = vector.broadcast %293 : vector<1x64xf32> to vector<8x64xf32>
    %295 = arith.addf %291, %294 : vector<8x64xf32>
    %cst_129 = arith.constant 5.000000e-01 : f32
    %296 = vector.broadcast %cst_129 : f32 to vector<8x64xf32>
    %297 = arith.mulf %296, %295 : vector<8x64xf32>
    %cst_130 = arith.constant 0.707106769 : f32
    %298 = vector.broadcast %cst_130 : f32 to vector<8x64xf32>
    %299 = arith.mulf %295, %298 : vector<8x64xf32>
    %300 = math.absf %299 : vector<8x64xf32>
    %cst_131 = arith.constant 0.327591091 : f32
    %301 = vector.broadcast %cst_131 : f32 to vector<8x64xf32>
    %302 = arith.mulf %301, %300 : vector<8x64xf32>
    %cst_132 = arith.constant 1.000000e+00 : f32
    %303 = vector.broadcast %cst_132 : f32 to vector<8x64xf32>
    %304 = arith.addf %303, %302 : vector<8x64xf32>
    %cst_133 = arith.constant 1.000000e+00 : f32
    %305 = vector.broadcast %cst_133 : f32 to vector<8x64xf32>
    %306 = arith.divf %305, %304 : vector<8x64xf32>
    %cst_134 = arith.constant 1.06140542 : f32
    %307 = vector.broadcast %cst_134 : f32 to vector<8x64xf32>
    %308 = arith.mulf %306, %307 : vector<8x64xf32>
    %cst_135 = arith.constant -1.45315206 : f32
    %309 = vector.broadcast %cst_135 : f32 to vector<8x64xf32>
    %310 = arith.addf %309, %308 : vector<8x64xf32>
    %311 = arith.mulf %306, %310 : vector<8x64xf32>
    %cst_136 = arith.constant 1.42141378 : f32
    %312 = vector.broadcast %cst_136 : f32 to vector<8x64xf32>
    %313 = arith.addf %312, %311 : vector<8x64xf32>
    %314 = arith.mulf %306, %313 : vector<8x64xf32>
    %cst_137 = arith.constant -0.284496725 : f32
    %315 = vector.broadcast %cst_137 : f32 to vector<8x64xf32>
    %316 = arith.addf %315, %314 : vector<8x64xf32>
    %317 = arith.mulf %306, %316 : vector<8x64xf32>
    %cst_138 = arith.constant 0.254829586 : f32
    %318 = vector.broadcast %cst_138 : f32 to vector<8x64xf32>
    %319 = arith.addf %318, %317 : vector<8x64xf32>
    %320 = arith.mulf %306, %319 : vector<8x64xf32>
    %cst_139 = arith.constant 0.000000e+00 : f32
    %321 = vector.broadcast %cst_139 : f32 to vector<8x64xf32>
    %322 = arith.subf %321, %299 : vector<8x64xf32>
    %323 = arith.mulf %322, %299 : vector<8x64xf32>
    %324 = math.exp %323 : vector<8x64xf32>
    %325 = arith.mulf %320, %324 : vector<8x64xf32>
    %cst_140 = arith.constant 1.000000e+00 : f32
    %326 = vector.broadcast %cst_140 : f32 to vector<8x64xf32>
    %327 = arith.subf %326, %325 : vector<8x64xf32>
    %cst_141 = arith.constant 0.000000e+00 : f32
    %328 = vector.broadcast %cst_141 : f32 to vector<8x64xf32>
    %329 = arith.cmpf oge, %299, %328 : vector<8x64xf32>
    %cst_142 = arith.constant 0.000000e+00 : f32
    %330 = vector.broadcast %cst_142 : f32 to vector<8x64xf32>
    %331 = arith.subf %330, %327 : vector<8x64xf32>
    %332 = arith.select %329, %327, %331 : vector<8x64xi1>, vector<8x64xf32>
    %cst_143 = arith.constant 1.000000e+00 : f32
    %333 = vector.broadcast %cst_143 : f32 to vector<8x64xf32>
    %334 = arith.addf %333, %332 : vector<8x64xf32>
    %335 = arith.mulf %297, %334 : vector<8x64xf32>
    %336 = arith.truncf %335 : vector<8x64xf32> to vector<8x64xbf16>
    %c1_144 = arith.constant 1 : index
    %c0_145 = arith.constant 0 : index
    %c0_146 = arith.constant 0 : index
    %337 = vector.load %arg13[%c1_144, %c0_145, %c0_146] : memref<2x64x32xbf16, #tpu.memory_space<vmem>>, vector<1x64x32xbf16>
    %338 = vector.shape_cast %337 : vector<1x64x32xbf16> to vector<64x32xbf16>
    %cst_147 = arith.constant dense<0.000000e+00> : vector<8x32xf32>
    %339 = tpu.matmul %336, %338, %cst_147 {dimension_numbers = #tpu.dot_dimension_numbers<[1], [0], [0], [1], [0, 0, 1, 1], [], []>} : vector<8x64xbf16>, vector<64x32xbf16>, vector<8x32xf32> -> vector<8x32xf32>
    %c1_148 = arith.constant 1 : index
    %c0_149 = arith.constant 0 : index
    %c0_150 = arith.constant 0 : index
    %340 = vector.load %arg14[%c1_148, %c0_149, %c0_150] : memref<2x1x32xf32, #tpu.memory_space<vmem>>, vector<1x1x32xf32>
    %341 = vector.shape_cast %340 : vector<1x1x32xf32> to vector<1x32xf32>
    %342 = vector.broadcast %341 : vector<1x32xf32> to vector<8x32xf32>
    %343 = arith.addf %339, %342 : vector<8x32xf32>
    %344 = arith.addf %343, %287 : vector<8x32xf32>
    %c1_151 = arith.constant 1 : index
    %c0_152 = arith.constant 0 : index
    %c0_153 = arith.constant 0 : index
    %345 = vector.load %arg15[%c1_151, %c0_152, %c0_153] : memref<2x1x32xf32, #tpu.memory_space<vmem>>, vector<1x1x32xf32>
    %346 = vector.shape_cast %345 : vector<1x1x32xf32> to vector<1x32xf32>
    %c1_154 = arith.constant 1 : index
    %c0_155 = arith.constant 0 : index
    %c0_156 = arith.constant 0 : index
    %347 = vector.load %arg16[%c1_154, %c0_155, %c0_156] : memref<2x1x32xf32, #tpu.memory_space<vmem>>, vector<1x1x32xf32>
    %348 = vector.shape_cast %347 : vector<1x1x32xf32> to vector<1x32xf32>
    %cst_157 = arith.constant dense<0.000000e+00> : vector<8xf32>
    %349 = vector.multi_reduction <add>, %344, %cst_157 [1] : vector<8x32xf32> to vector<8xf32>
    %350 = vector.shape_cast %349 : vector<8xf32> to vector<8x1xf32>
    %cst_158 = arith.constant 3.200000e+01 : f32
    %351 = vector.broadcast %cst_158 : f32 to vector<8x1xf32>
    %352 = arith.divf %350, %351 : vector<8x1xf32>
    %353 = vector.broadcast %352 : vector<8x1xf32> to vector<8x32xf32>
    %354 = arith.subf %344, %353 : vector<8x32xf32>
    %355 = arith.mulf %354, %354 : vector<8x32xf32>
    %cst_159 = arith.constant dense<0.000000e+00> : vector<8xf32>
    %356 = vector.multi_reduction <add>, %355, %cst_159 [1] : vector<8x32xf32> to vector<8xf32>
    %357 = vector.shape_cast %356 : vector<8xf32> to vector<8x1xf32>
    %cst_160 = arith.constant 3.200000e+01 : f32
    %358 = vector.broadcast %cst_160 : f32 to vector<8x1xf32>
    %359 = arith.divf %357, %358 : vector<8x1xf32>
    %360 = vector.broadcast %352 : vector<8x1xf32> to vector<8x32xf32>
    %361 = arith.subf %344, %360 : vector<8x32xf32>
    %cst_161 = arith.constant 9.99999996E-13 : f32
    %362 = vector.broadcast %cst_161 : f32 to vector<8x1xf32>
    %363 = arith.addf %359, %362 : vector<8x1xf32>
    %364 = math.rsqrt %363 : vector<8x1xf32>
    %365 = vector.broadcast %364 : vector<8x1xf32> to vector<8x32xf32>
    %366 = arith.mulf %361, %365 : vector<8x32xf32>
    %367 = vector.broadcast %346 : vector<1x32xf32> to vector<8x32xf32>
    %368 = arith.mulf %366, %367 : vector<8x32xf32>
    %369 = vector.broadcast %348 : vector<1x32xf32> to vector<8x32xf32>
    %370 = arith.addf %368, %369 : vector<8x32xf32>
    %371 = vector.extract_strided_slice %370 {offsets = [0, 0], sizes = [1, 32], strides = [1, 1]} : vector<8x32xf32> to vector<1x32xf32>
    %372 = arith.truncf %371 : vector<1x32xf32> to vector<1x32xbf16>
    %c0_162 = arith.constant 0 : index
    %c0_163 = arith.constant 0 : index
    %373 = vector.load %arg17[%c0_162, %c0_163] : memref<32x32xbf16, #tpu.memory_space<vmem>>, vector<32x32xbf16>
    %cst_164 = arith.constant dense<0.000000e+00> : vector<1x32xf32>
    %374 = tpu.matmul %372, %373, %cst_164 {dimension_numbers = #tpu.dot_dimension_numbers<[1], [0], [0], [1], [0, 0, 1, 1], [], []>} : vector<1x32xbf16>, vector<32x32xbf16>, vector<1x32xf32> -> vector<1x32xf32>
    %c0_165 = arith.constant 0 : index
    %c0_166 = arith.constant 0 : index
    %375 = vector.load %arg18[%c0_165, %c0_166] : memref<1x32xf32, #tpu.memory_space<vmem>>, vector<1x32xf32>
    %376 = arith.addf %374, %375 : vector<1x32xf32>
    %377 = math.tanh %376 : vector<1x32xf32>
    %c0_167 = arith.constant 0 : index
    %c0_168 = arith.constant 0 : index
    %c0_169 = arith.constant 0 : index
    %378 = vector.load %arg19[%c0_167, %c0_168, %c0_169] : memref<1x1x32xf32, #tpu.memory_space<vmem>>, vector<1x1x32xf32>
    %379 = vector.shape_cast %378 : vector<1x1x32xf32> to vector<1x32xf32>
    %380 = vector.shape_cast %377 : vector<1x32xf32> to vector<1x1x32xf32>
    tpu.vector_store %arg19[%c0_167, %c0_168, %c0_169], %380 {strides = array<i32>} : memref<1x1x32xf32, #tpu.memory_space<vmem>>, vector<1x1x32xf32>,
    return
  }
  func.func @transform_0(%arg0: i32) -> (i32, i32, i32) {
    %c0_i32 = arith.constant 0 : i32
    %c0_i32_0 = arith.constant 0 : i32
    %c0_i32_1 = arith.constant 0 : i32
    return %arg0, %c0_i32, %c0_i32_0 : i32, i32, i32
  }
  func.func @transform_1(%arg0: i32) -> (i32, i32, i32) {
    %c0_i32 = arith.constant 0 : i32
    %c0_i32_0 = arith.constant 0 : i32
    %c0_i32_1 = arith.constant 0 : i32
    return %arg0, %c0_i32, %c0_i32_0 : i32, i32, i32
  }
  func.func @transform_2(%arg0: i32) -> (i32, i32) {
    %c0_i32 = arith.constant 0 : i32
    %c0_i32_0 = arith.constant 0 : i32
    %c0_i32_1 = arith.constant 0 : i32
    return %c0_i32, %c0_i32_0 : i32, i32
  }
  func.func @transform_3(%arg0: i32) -> (i32, i32) {
    %c0_i32 = arith.constant 0 : i32
    %c0_i32_0 = arith.constant 0 : i32
    %c0_i32_1 = arith.constant 0 : i32
    return %c0_i32, %c0_i32_0 : i32, i32
  }
  func.func @transform_4(%arg0: i32) -> (i32, i32, i32) {
    %c0_i32 = arith.constant 0 : i32
    %c0_i32_0 = arith.constant 0 : i32
    %c0_i32_1 = arith.constant 0 : i32
    %c0_i32_2 = arith.constant 0 : i32
    return %c0_i32, %c0_i32_0, %c0_i32_1 : i32, i32, i32
  }
  func.func @transform_5(%arg0: i32) -> (i32, i32, i32) {
    %c0_i32 = arith.constant 0 : i32
    %c0_i32_0 = arith.constant 0 : i32
    %c0_i32_1 = arith.constant 0 : i32
    %c0_i32_2 = arith.constant 0 : i32
    return %c0_i32, %c0_i32_0, %c0_i32_1 : i32, i32, i32
  }
  func.func @transform_6(%arg0: i32) -> (i32, i32, i32) {
    %c0_i32 = arith.constant 0 : i32
    %c0_i32_0 = arith.constant 0 : i32
    %c0_i32_1 = arith.constant 0 : i32
    %c0_i32_2 = arith.constant 0 : i32
    return %c0_i32, %c0_i32_0, %c0_i32_1 : i32, i32, i32
  }
  func.func @transform_7(%arg0: i32) -> (i32, i32, i32) {
    %c0_i32 = arith.constant 0 : i32
    %c0_i32_0 = arith.constant 0 : i32
    %c0_i32_1 = arith.constant 0 : i32
    %c0_i32_2 = arith.constant 0 : i32
    return %c0_i32, %c0_i32_0, %c0_i32_1 : i32, i32, i32
  }
  func.func @transform_8(%arg0: i32) -> (i32, i32, i32) {
    %c0_i32 = arith.constant 0 : i32
    %c0_i32_0 = arith.constant 0 : i32
    %c0_i32_1 = arith.constant 0 : i32
    %c0_i32_2 = arith.constant 0 : i32
    return %c0_i32, %c0_i32_0, %c0_i32_1 : i32, i32, i32
  }
  func.func @transform_9(%arg0: i32) -> (i32, i32, i32) {
    %c0_i32 = arith.constant 0 : i32
    %c0_i32_0 = arith.constant 0 : i32
    %c0_i32_1 = arith.constant 0 : i32
    %c0_i32_2 = arith.constant 0 : i32
    return %c0_i32, %c0_i32_0, %c0_i32_1 : i32, i32, i32
  }
  func.func @transform_10(%arg0: i32) -> (i32, i32, i32) {
    %c0_i32 = arith.constant 0 : i32
    %c0_i32_0 = arith.constant 0 : i32
    %c0_i32_1 = arith.constant 0 : i32
    %c0_i32_2 = arith.constant 0 : i32
    return %c0_i32, %c0_i32_0, %c0_i32_1 : i32, i32, i32
  }
  func.func @transform_11(%arg0: i32) -> (i32, i32, i32) {
    %c0_i32 = arith.constant 0 : i32
    %c0_i32_0 = arith.constant 0 : i32
    %c0_i32_1 = arith.constant 0 : i32
    %c0_i32_2 = arith.constant 0 : i32
    return %c0_i32, %c0_i32_0, %c0_i32_1 : i32, i32, i32
  }
  func.func @transform_12(%arg0: i32) -> (i32, i32, i32) {
    %c0_i32 = arith.constant 0 : i32
    %c0_i32_0 = arith.constant 0 : i32
    %c0_i32_1 = arith.constant 0 : i32
    %c0_i32_2 = arith.constant 0 : i32
    return %c0_i32, %c0_i32_0, %c0_i32_1 : i32, i32, i32
  }
  func.func @transform_13(%arg0: i32) -> (i32, i32, i32) {
    %c0_i32 = arith.constant 0 : i32
    %c0_i32_0 = arith.constant 0 : i32
    %c0_i32_1 = arith.constant 0 : i32
    %c0_i32_2 = arith.constant 0 : i32
    return %c0_i32, %c0_i32_0, %c0_i32_1 : i32, i32, i32
  }
  func.func @transform_14(%arg0: i32) -> (i32, i32, i32) {
    %c0_i32 = arith.constant 0 : i32
    %c0_i32_0 = arith.constant 0 : i32
    %c0_i32_1 = arith.constant 0 : i32
    %c0_i32_2 = arith.constant 0 : i32
    return %c0_i32, %c0_i32_0, %c0_i32_1 : i32, i32, i32
  }
  func.func @transform_15(%arg0: i32) -> (i32, i32, i32) {
    %c0_i32 = arith.constant 0 : i32
    %c0_i32_0 = arith.constant 0 : i32
    %c0_i32_1 = arith.constant 0 : i32
    %c0_i32_2 = arith.constant 0 : i32
    return %c0_i32, %c0_i32_0, %c0_i32_1 : i32, i32, i32
  }
  func.func @transform_16(%arg0: i32) -> (i32, i32) {
    %c0_i32 = arith.constant 0 : i32
    %c0_i32_0 = arith.constant 0 : i32
    %c0_i32_1 = arith.constant 0 : i32
    return %c0_i32, %c0_i32_0 : i32, i32
  }
  func.func @transform_17(%arg0: i32) -> (i32, i32) {
    %c0_i32 = arith.constant 0 : i32
    %c0_i32_0 = arith.constant 0 : i32
    %c0_i32_1 = arith.constant 0 : i32
    return %c0_i32, %c0_i32_0 : i32, i32
  }
  func.func @transform_18(%arg0: i32) -> (i32, i32, i32) {
    %c0_i32 = arith.constant 0 : i32
    %c0_i32_0 = arith.constant 0 : i32
    %c0_i32_1 = arith.constant 0 : i32
    return %arg0, %c0_i32, %c0_i32_0 : i32, i32, i32
  }
}

</mosaic_0001>

<bundles_post_ra>
// kernel: bert_encoder_forward.1
= control target key start
LH: loop header
LB: loop body
LE: loop exit
PB: predicated region body
PF: predicated region fallthrough
CT: control target
= control target key end

     0   :  { %s2891_s0 = inlined_call_operand.vmem [shape: bf16[2,8,32], index: 0, kind: input, shape index: {}]   ;;  %s2892_s1 = inlined_call_operand.vmem [shape: f32[2,1,8], index: 1, kind: input, shape index: {}]   ;;  %s2893_s2 = inlined_call_operand.vmem [shape: f32[1,32], index: 2, kind: input, shape index: {}]   ;;  %s2894_s3 = inlined_call_operand.vmem [shape: f32[1,32], index: 3, kind: input, shape index: {}]   ;;  %s2895_s4 = inlined_call_operand.vmem [shape: bf16[2,32,96], index: 4, kind: input, shape index: {}]   ;;  %s2896_s5 = inlined_call_operand.vmem [shape: f32[2,1,96], index: 5, kind: input, shape index: {}]   ;;  %s2897_s6 = inlined_call_operand.vmem [shape: bf16[2,32,32], index: 6, kind: input, shape index: {}]   ;;  %s2898_s7 = inlined_call_operand.vmem [shape: f32[2,1,32], index: 7, kind: input, shape index: {}]   ;;  %s2899_s8 = inlined_call_operand.vmem [shape: f32[2,1,32], index: 8, kind: input, shape index: {}]   ;;  %s2900_s9 = inlined_call_operand.vmem [shape: f32[2,1,32], index: 9, kind: input, shape index: {}]   ;;  %s2901_s10 = inlined_call_operand.vmem [shape: bf16[2,32,64], index: 10, kind: input, shape index: {}]   ;;  %s2902_s11 = inlined_call_operand.vmem [shape: f32[2,1,64], index: 11, kind: input, shape index: {}]   ;;  %s2903_s12 = inlined_call_operand.vmem [shape: bf16[2,64,32], index: 12, kind: input, shape index: {}]   ;;  %s2904_s13 = inlined_call_operand.vmem [shape: f32[2,1,32], index: 13, kind: input, shape index: {}]   ;;  %s2905_s14 = inlined_call_operand.vmem [shape: f32[2,1,32], index: 14, kind: input, shape index: {}]   ;;  %s2906_s15 = inlined_call_operand.vmem [shape: f32[2,1,32], index: 15, kind: input, shape index: {}]   ;;  %s2907_s16 = inlined_call_operand.vmem [shape: bf16[32,32], index: 16, kind: input, shape index: {}]   ;;  %s2908_s17 = inlined_call_operand.vmem [shape: f32[1,32], index: 17, kind: input, shape index: {}]   ;;  %s2909_s18 = inlined_call_operand.hbm [shape: f32[2,1,32], index: 18, kind: output, shape index: {}]  }
   0x1   :  { %2916 = sst [smem:[#allocation7_spill]] %s2891_s0 }
   0x2   :  { %2917 = sst [smem:[#allocation8_spill]] %s2892_s1 }
   0x3   :  { %2918 = sst [smem:[#allocation9_spill]] %s2893_s2 }
   0x4   :  { %2919 = sst [smem:[#allocation10_spill]] %s2894_s3 }
   0x5   :  { %2920 = sst [smem:[#allocation11_spill]] %s2895_s4 }
   0x6   :  { %2921 = sst [smem:[#allocation12_spill]] %s2896_s5 }
   0x7   :  { %23 = vsyncpa [#allocation3], 0 }
   0x8   :  { %25 = vsyncpa [#allocation3 + $0x1], 0  ;;  %s2524_s27 = smov 0   ;;  %s2526_s28 = smov 0  }
   0x9   :  { %s2528_s29 = smov 0   ;;  %s2530_s30 = smov 0  }
   0xa LB: > { %2922 = sst [smem:[#allocation5_spill]] %s2414_s29  ;;  %s2545_s0 = sadd.s32 4294967295, %s2418_s30   ;;  %s2418_s30 = sphi %s2530_s30, %s2941_s30   ;;  %s2414_s29 = sphi %s2528_s29, %s2938_s29   ;;  %s2410_s28 = sphi %s2526_s28, %s2940_s28   ;;  %s2406_s27 = sphi %s2524_s27, %s2939_s27  }
   0xb   : > { %s1982_s19 = sadd.s32 4294967294, %s2418_s30   ;;  %s2549_s1 = sadd.s32 1, %s2418_s30  }
   0xc   : > { %s426_s20 = sadd.s32 1, %s2414_s29  ;;  %s423_s21 = ssub.s32 %s2418_s30, %s2549_s1 }
   0xd   : > { %p436_p0 = scmp.ne.s32.totalorder %s2414_s29, %s2410_s28  ;;  %p424_p1 = scmp.eq.s32.totalorder %s423_s21, 0 }
   0xe   : > { %p437_p2 = scmp.eq.s32.totalorder %s2545_s0, 1  ;;  %p442_p3 = scmp.ne.s32.totalorder %s2410_s28, %s2406_s27 }
   0xf   : > { %p443_p4 = scmp.eq.s32.totalorder %s1982_s19, 1  ;;  %p1985_p7 = scmp.ge.s32.totalorder %s2418_s30, 1 }
  0x10   : > { %s2560_s22 = scalar_select %p424_p1, %s2414_s29, %s426_s20  }
  0x11   : > { %p2562_p5 = por %p437_p2, %p436_p0  ;;  %p2566_p6 = por %p443_p4, %p442_p3 }
  0x12   : > { %2923 = sst [smem:[#allocation6_spill]] %s2560_s22  ;;  %p522_p8 = scmp.lt.s32.totalorder %s2418_s30, 3 }
  0x14   : > { %p523_p9 = pnand %p1985_p7, %p522_p8 }
  0x15   : > { %p577_p10 = scmp.lt.s32.totalorder (!%p523_p9), %s2545_s0, 1  ;;  %vm590_vm0 = vcmask (!%p523_p9), 261120   ;;  %s2926_s20 = sld [smem:[#allocation7_spill]] (!%p523_p9)  ;;  %v2420_v9 = vmov (!%p523_p9), 0.0   ;;  %vm2421_vm1 = vmmov (!%p523_p9), 0   ;;  %vm690_vm2 = vcmask (!%p523_p9), 130048  }
  0x16   : > { %526 = sbr.rel (%p523_p9) target bundleno = 5661 (0x161d), region = 92  ;;  %s2927_s4 = sld [smem:[#allocation11_spill]] (!%p523_p9)  ;;  %2123 = vmatprep.subr.bf16.mxu0 (!%p523_p9), %v2420_v9  ;;  %2131 = vmatprep.subr.bf16.mxu1 (!%p523_p9), %v2420_v9  ;;  %vm745_vm3 = vcmask (!%p523_p9), 64512   ;;  %vm763_vm4 = vcmask (!%p523_p9), 1043456   ;;  %vm1155_vm6 = vcmask (!%p523_p9), 523264   ;;  %vm1903_vm8 = vcmask (!%p523_p9), 253952  }
  0x17   : > { %2127 = vmatprep.mubr.msk.bf16.mxu0 (!%p523_p9), %vm2421_vm1, %v2420_v9  ;;  %2133 = vmatprep.mubr.msk.bf16.mxu1 (!%p523_p9), %vm2421_vm1, %v2420_v9  ;;  %s2928_s19 = sld [smem:[#allocation9_spill]] (!%p523_p9)  ;;  %s2929_s3 = sld [smem:[#allocation10_spill]] (!%p523_p9) }
  0x18   : > { %s2930_s5 = sld [smem:[#allocation12_spill]] (!%p523_p9)  ;;  %s2914_s29 = smov (!%p523_p9), 112  }
  0x19   : > { %s2915_s22 = smov (!%p523_p9), 96  }
  0x1c   : > { %v2298_v8 = vld [vmem:[%s2927_s4] sm:$0xff] (!%p523_p9)   ;;  %v2299_v10 = vld [vmem:[%s2927_s4 + $0x8] sm:$0xff] (!%p523_p9)  }
  0x1d   : > { %s2574_s24 = scalar_select %p577_p10, %s2545_s0, 1  ;;  %2124 = vmatpush3.bf16.msra.mxu0 %v2298_v8  ;;  %v1987_v15 = vld [vmem:[%s2928_s19] ss:$0 sm:$0xff] }
  0x1e   : > { %2125 = vmatprep.subr.bf16.mxu0 %v2420_v9  ;;  %v1988_v17 = vld [vmem:[%s2929_s3] ss:$0 sm:$0xff]  ;;  %s2424_s19 = smov 80  }
  0x1f   : > { %s1986_s25 = sshll.u32 %s2574_s24, 2  ;;  %v1989_v21 = vld [vmem:[%s2930_s5] ss:$0 sm:$0xff] }
  0x20   : > { %s580_s21 = scalar_lea.vmem %s2926_s20, %s1986_s25  ;;  %s2931_s25 = sld [smem:[#allocation8_spill]] }
  0x21   : > { %v586_v0 = vld [vmem:[%s580_s21] sm:$0xf]  ;;  %2126 = vmatpush3.bf16.msra.mxu0 %v2299_v10  ;;  %s2912_s20 = smov 64   ;;  %s2932_s21 = smov 96  }
  0x22   : > { %v587_v1 = vunpack.c.l.bf16 %v586_v0  ;;  %2137 = vmatprep.subr.bf16.mxu0 %v2420_v9 }
  0x24   : > { %v591_v2 = vsel %vm590_vm0, %v587_v1, 0.0 }
  0x25   : > { %592 = vadd.xlane.f32.xlu0 %v591_v2 }
  0x26   : > { %s583_s26 = scalar_lea.vmem %s2931_s25, %s2574_s24  ;;  %s2911_s24 = smov 48  }
  0x27   : > { %v2629_v34 = vld [vmem:[%s583_s26] ss:$0 sm:$0xff] }
  0xb2   : > { %v593_v3 = vpop.xlane.xlu0 %592 }
  0xb3   : > { %v595_v4 = vmul.f32 0.03125, %v593_v3 }
  0xb5   : > { %v596_v5 = vsub.f32 %v587_v1, %v595_v4 }
  0xb7   : > { %v597_v6 = vmul.f32 %v596_v5, %v596_v5 }
  0xb9   : > { %v598_v7 = vsel %vm590_vm0, %v597_v6, 0.0  ;;  %v2300_v6 = vld [vmem:[%s2897_s6] sm:$0xff]  }
  0xba   : > { %599 = vadd.xlane.f32.xlu0 %v598_v7  ;;  %v2301_v7 = vld [vmem:[%s2897_s6 + $0x8] sm:$0xff]  }
 0x147   : > { %v600_v11 = vpop.xlane.xlu0 %599 }
 0x148   : > { %v601_v12 = vmul.f32 0.03125, %v600_v11 }
 0x14a   : > { %v602_v13 = vadd.f32 1e-12, %v601_v12 }
 0x14c   : > { %2320 = vrsqrt.f32 %v602_v13 }
 0x156   : > { %v2321_v14 = vpop.eup %2320 }
 0x157   : > { %v604_v16 = vmul.f32 %v2321_v14, %v596_v5 }
 0x159   : > { %v611_v18 = vmul.f32 %v1987_v15, %v604_v16 }
 0x15b   : > { %v2602_v19 = vadd.f32 %v1988_v17, %v611_v18 }
 0x15d   : > { %v619_v20 = vpack.c.bf16 %v2602_v19, %v2602_v19 }
 0x15f   : > { %2128 = vmatmul.mubr.msk.bf16.vlgmr.msra.gmra.mrb[0].mxu0 %vm590_vm0, %v619_v20 }
 0x160   : > { %2139 = vmatprep.mubr.msk.bf16.mxu0 %vm2421_vm1, %v2420_v9 }
 0x232   : > { %v680_v22 = vpop.f32.mrb[0].mxu0 }
 0x233   : > { %v681_v23 = vadd.f32 %v1989_v21, %v680_v22  ;;  %v2129_v24 = vpop.f32.mrb[1].mxu0  ;;  %v1998_v21 = vld [vmem:[%s2898_s7] ss:$0 sm:$0xff] }
 0x234   : > { %v683_v25 = vpop.f32.mrb[2].mxu0 }
 0x235   : > { %v686_v26 = vpack.c.bf16 %v681_v23, %v681_v23  ;;  %v2130_v27 = vpop.f32.mrb[3].mxu0 }
 0x237   : > { %807 = vrot.lane.b32.xlu0 %v686_v26, %s2914_s29  ;;  %688 = vrot.lane.b32.xlu1 %v686_v26, %s2915_s22  ;;  %s2933_s29 = smov 112   ;;  %s2935_s22 = smov 48  }
 0x23b   : > { %809 = vrot.lane.b32.xlu1 %v686_v26, %s2424_s19 }
 0x2a9   : > { %v689_v28 = vpop.permute.xlu1 %688  ;;  %v808_v32 = vpop.permute.xlu0 %807 }
 0x2aa   : > { %v695_v29 = vsel %vm690_vm2, %v689_v28, 0 }
 0x2ab   : > { %2132 = vmatpush3.bf16.xpose.msra.mxu1 %v695_v29 }
 0x2ac   : > { %2143 = vmatprep.subr.bf16.mxu1 %v2420_v9 }
 0x2ad   : > { %v810_v30 = vpop.permute.xlu1 %809 }
 0x2ae   : > { %v815_v31 = vsel %vm690_vm2, %v810_v30, 0 }
 0x2b2   : > { %2134 = vmatmul.mubr.msk.bf16.vlgmr.msra.gmra.mrb[0].mxu1 %vm690_vm2, %v686_v26 }
 0x2b3   : > { %2144 = vmatpush3.bf16.xpose.msra.mxu1 %v815_v31  ;;  %2145 = vmatprep.mubr.msk.bf16.mxu1 %vm2421_vm1, %v2420_v9 }
 0x2b4   : > { %2155 = vmatprep.subr.bf16.mxu1 %v2420_v9 }
 0x2ba   : > { %2146 = vmatmul.mubr.msk.bf16.vlgmr.msra.gmra.mrb[4].mxu1 %vm690_vm2, %v808_v32 }
 0x2bb   : > { %2159 = vmatprep.mubr.msk.bf16.mxu1 %vm2421_vm1, %v2420_v9  ;;  %2156 = vmatpush3.bf16.msra.mxu1 %v2300_v6 }
 0x2bc   : > { %2157 = vmatprep.subr.bf16.mxu1 %v2420_v9 }
 0x2bf   : > { %2158 = vmatpush3.bf16.msra.mxu1 %v2301_v7 }
 0x2c0   : > { %2171 = vmatprep.subr.bf16.mxu1 %v2420_v9 }
 0x385   : > { %v731_v33 = vpop.f32.mrb[0].mxu1 }
 0x386   : > { %v737_v35 = vmul.f32 0.25, %v731_v33  ;;  %v2135_v36 = vpop.f32.mrb[1].mxu1 }
 0x387   : > { %v734_v37 = vpop.f32.mrb[2].mxu1 }
 0x388   : > { %v2136_v38 = vpop.f32.mrb[3].mxu1  ;;  %v744_v39 = vadd.f32 %v2629_v34, %v737_v35  ;;  %v2302_v35 = vld [vmem:[%s2901_s10] sm:$0xff]  }
 0x38a   : > { %v746_v40 = vsel %vm745_vm3, %v744_v39, -inf }
 0x38b   : > { %747 = vmax.xlane.f32.xlu1 %v746_v40  ;;  %v2002_v40 = vld [vmem:[%s2899_s8] ss:$0 sm:$0xff] }
 0x38d   : > { %v851_v41 = vpop.f32.mrb[4].mxu1 }
 0x38e   : > { %v857_v42 = vmul.f32 0.25, %v851_v41  ;;  %v2147_v43 = vpop.f32.mrb[5].mxu1 }
 0x38f   : > { %v854_v44 = vpop.f32.mrb[6].mxu1 }
 0x390   : > { %v2148_v45 = vpop.f32.mrb[7].mxu1  ;;  %v858_v46 = vadd.f32 %v2629_v34, %v857_v42  ;;  %v2003_v42 = vld [vmem:[%s2900_s9] ss:$0 sm:$0xff] }
 0x392   : > { %v859_v47 = vsel %vm745_vm3, %v858_v46, -inf }
 0x393   : > { %860 = vmax.xlane.f32.xlu0 %v859_v47  ;;  %v2305_v47 = vld [vmem:[%s2903_s12 + $0x8] sm:$0xff]  }
 0x3a9   : > { %871 = vrot.lane.b32.xlu0 %v686_v26, %s2911_s24 }
 0x418   : > { %v748_v48 = vpop.xlane.xlu1 %747 }
 0x419   : > { %v749_v49 = vsub.f32 %v744_v39, %v748_v48  ;;  %v2306_v48 = vld [vmem:[%s2903_s12 + $0x10] sm:$0xff]  }
 0x41b   : > { %v750_v50 = vmul.f32 1.442695, %v749_v49  ;;  %v2307_v49 = vld [vmem:[%s2903_s12 + $0x18] sm:$0xff]  }
 0x41d   : > { %2322 = vpow2.f32 %v750_v50  ;;  %v2004_v50 = vld [vmem:[%s2902_s11] ss:$0 sm:$0xff] }
 0x420   : > { %v861_v51 = vpop.xlane.xlu0 %860 }
 0x421   : > { %v862_v52 = vsub.f32 %v858_v46, %v861_v51  ;;  %v2304_v46 = vld [vmem:[%s2903_s12] sm:$0xff]  }
 0x423   : > { %v863_v53 = vmul.f32 1.442695, %v862_v52 }
 0x424   : > { %v872_v0 = vpop.permute.xlu0 %871 }
 0x425   : > { %2324 = vpow2.f32 %v863_v53  ;;  %v877_v2 = vsel %vm763_vm4, %v872_v0, 0 }
 0x427   : > { %v2323_v54 = vpop.eup %2322 }
 0x428   : > { %v752_v55 = vsel %vm745_vm3, %v2323_v54, 0.0 }
 0x429   : > { %753 = vadd.xlane.f32.xlu1 %v752_v55 }
 0x42f   : > { %v2325_v56 = vpop.eup %2324 }
 0x430   : > { %v865_v57 = vsel %vm745_vm3, %v2325_v56, 0.0 }
 0x431   : > { %866 = vadd.xlane.f32.xlu1 %v865_v57 }
 0x442   : > { %758 = vrot.lane.b32.xlu1 %v686_v26, %s2912_s20  ;;  %s2913_s20 = smov 16  }
 0x4b6   : > { %v754_v58 = vpop.xlane.xlu1 %753 }
 0x4b7   : > { %2326 = vrcp.f32 %v754_v58 }
 0x4be   : > { %v867_v59 = vpop.xlane.xlu1 %866 }
 0x4bf   : > { %2328 = vrcp.f32 %v867_v59 }
 0x4c1   : > { %v2327_v60 = vpop.eup %2326 }
 0x4c2   : > { %v756_v61 = vmul.f32 %v2327_v60, %v2323_v54  ;;  %v759_v62 = vpop.permute.xlu1 %758 }
 0x4c3   : > { %v765_v63 = vsel %vm763_vm4, %v759_v62, 0 }
 0x4c4   : > { %2138 = vmatpush3.bf16.msra.mxu0 %v765_v63  ;;  %v757_v1 = vpack.c.bf16 %v756_v61, %v756_v61 }
 0x4c5   : > { %2149 = vmatprep.subr.bf16.mxu0 %v2420_v9 }
 0x4c7   : > { %2140 = vmatmul.mubr.msk.bf16.vlgmr.msra.gmra.mrb[4].mxu0 %vm745_vm3, %v757_v1 }
 0x4c8   : > { %2150 = vmatpush3.bf16.msra.mxu0 %v877_v2  ;;  %2151 = vmatprep.mubr.msk.bf16.mxu0 %vm2421_vm1, %v2420_v9 }
 0x4c9   : > { %v2329_v3 = vpop.eup %2328  ;;  %2163 = vmatprep.subr.bf16.mxu0 %v2420_v9 }
 0x4ca   : > { %v869_v4 = vmul.f32 %v2329_v3, %v2325_v56 }
 0x4cc   : > { %v870_v5 = vpack.c.bf16 %v869_v4, %v869_v4 }
 0x4cf   : > { %2152 = vmatmul.mubr.msk.bf16.vlgmr.msra.gmra.mrb[8].mxu0 %vm745_vm3, %v870_v5 }
 0x4d0   : > { %2167 = vmatprep.mubr.msk.bf16.mxu0 %vm2421_vm1, %v2420_v9  ;;  %2164 = vmatpush3.bf16.msra.mxu0 %v2302_v35  ;;  %v2309_v35 = vld [vmem:[%s2927_s4 + $0x18] sm:$0xff]  }
 0x4d1   : > { %2165 = vmatprep.subr.bf16.mxu0 %v2420_v9 }
 0x59a   : > { %v801_v8 = vpop.f32.mrb[4].mxu0 }
 0x59b   : > { %v2141_v10 = vpop.f32.mrb[5].mxu0 }
 0x59c   : > { %v804_v11 = vpop.f32.mrb[6].mxu0 }
 0x59d   : > { %v2142_v12 = vpop.f32.mrb[7].mxu0 }
 0x5a2   : > { %v913_v13 = vpop.f32.mrb[8].mxu0 }
 0x5a3   : > { %920 = vrot.lane.b32.xlu1 %v913_v13, %s2913_s20  ;;  %v2153_v14 = vpop.f32.mrb[9].mxu0 }
 0x5a4   : > { %v916_v15 = vpop.f32.mrb[10].mxu0 }
 0x5a5   : > { %v2154_v16 = vpop.f32.mrb[11].mxu0 }
 0x615   : > { %v921_v17 = vpop.permute.xlu1 %920 }
 0x616   : > { %v923_v18 = vsel %vm690_vm2, %v801_v8, %v921_v17 }
 0x617   : > { %v924_v20 = vpack.c.bf16 %v923_v18, %v923_v18 }
 0x619   : > { %2160 = vmatmul.mubr.msk.bf16.vlgmr.msra.gmra.mrb[8].mxu1 %vm590_vm0, %v924_v20  ;;  %v2008_v20 = vld [vmem:[%s2904_s13] ss:$0 sm:$0xff] }
 0x61a   : > { %2179 = vmatprep.mubr.msk.bf16.mxu1 %vm2421_vm1, %v2420_v9  ;;  %2172 = vmatpush3.bf16.msra.mxu1 %v2304_v46 }
 0x61b   : > { %2173 = vmatprep.subr.bf16.mxu1 %v2420_v9 }
 0x61e   : > { %2174 = vmatpush3.bf16.msra.mxu1 %v2305_v47 }
 0x61f   : > { %2175 = vmatprep.subr.bf16.mxu1 %v2420_v9 }
 0x622   : > { %2176 = vmatpush3.bf16.msra.mxu1 %v2306_v48 }
 0x623   : > { %2177 = vmatprep.subr.bf16.mxu1 %v2420_v9 }
 0x626   : > { %2178 = vmatpush3.bf16.msra.mxu1 %v2307_v49 }
 0x627   : > { %2197 = vmatprep.subr.bf16.mxu1 %v2420_v9 }
 0x6ec   : > { %v985_v22 = vpop.f32.mrb[8].mxu1 }
 0x6ed   : > { %v986_v23 = vadd.f32 %v1998_v21, %v985_v22  ;;  %v2161_v24 = vpop.f32.mrb[9].mxu1 }
 0x6ee   : > { %v988_v25 = vpop.f32.mrb[10].mxu1 }
 0x6ef   : > { %v2162_v26 = vpop.f32.mrb[11].mxu1  ;;  %v991_v27 = vadd.f32 %v986_v23, %v2602_v19  ;;  %v2303_v19 = vld [vmem:[%s2901_s10 + $0x8] sm:$0xff]  }
 0x6f0   : > { %2166 = vmatpush3.bf16.msra.mxu0 %v2303_v19 }
 0x6f1   : > { %v994_v28 = vsel %vm590_vm0, %v991_v27, 0.0  ;;  %2183 = vmatprep.subr.bf16.mxu0 %v2420_v9 }
 0x6f2   : > { %995 = vadd.xlane.f32.xlu1 %v994_v28 }
 0x77f   : > { %v996_v29 = vpop.xlane.xlu1 %995 }
 0x780   : > { %v997_v30 = vmul.f32 0.03125, %v996_v29 }
 0x782   : > { %v998_v31 = vsub.f32 %v991_v27, %v997_v30 }
 0x784   : > { %v999_v32 = vmul.f32 %v998_v31, %v998_v31 }
 0x786   : > { %v1000_v33 = vsel %vm590_vm0, %v999_v32, 0.0 }
 0x787   : > { %1001 = vadd.xlane.f32.xlu0 %v1000_v33  ;;  %v2308_v33 = vld [vmem:[%s2927_s4 + $0x10] sm:$0xff]  }
 0x814   : > { %v1002_v36 = vpop.xlane.xlu0 %1001 }
 0x815   : > { %v1003_v37 = vmul.f32 0.03125, %v1002_v36 }
 0x817   : > { %v1004_v38 = vadd.f32 1e-12, %v1003_v37 }
 0x819   : > { %2330 = vrsqrt.f32 %v1004_v38 }
 0x823   : > { %v2331_v39 = vpop.eup %2330 }
 0x824   : > { %v1006_v41 = vmul.f32 %v2331_v39, %v998_v31  ;;  %v2014_v39 = vld [vmem:[%s2905_s14] ss:$0 sm:$0xff] }
 0x826   : > { %v1013_v43 = vmul.f32 %v2002_v40, %v1006_v41  ;;  %v2015_v41 = vld [vmem:[%s2906_s15] ss:$0 sm:$0xff] }
 0x828   : > { %v1020_v44 = vadd.f32 %v2003_v42, %v1013_v43 }
 0x82a   : > { %v1021_v45 = vpack.c.bf16 %v1020_v44, %v1020_v44 }
 0x82c   : > { %2168 = vmatmul.mubr.msk.bf16.vlgmr.msra.gmra.mrb[12].mxu0 %vm590_vm0, %v1021_v45  ;;  %v2021_v45 = vld [vmem:[%s2930_s5 + $0x1] ss:$0 sm:$0xff] }
 0x82d   : > { %2187 = vmatprep.mubr.msk.bf16.mxu0 %vm2421_vm1, %v2420_v9  ;;  %2184 = vmatpush3.bf16.msra.mxu0 %v2308_v33 }
 0x82e   : > { %2185 = vmatprep.subr.bf16.mxu0 %v2420_v9 }
 0x831   : > { %2186 = vmatpush3.bf16.msra.mxu0 %v2309_v35 }
 0x832   : > { %2191 = vmatprep.subr.bf16.mxu0 %v2420_v9 }
 0x8ff   : > { %v1082_v51 = vpop.f32.mrb[12].mxu0 }
 0x900   : > { %v1083_v52 = vadd.f32 %v2004_v50, %v1082_v51  ;;  %v2169_v53 = vpop.f32.mrb[13].mxu0 }
 0x901   : > { %v1085_v54 = vpop.f32.mrb[14].mxu0 }
 0x902   : > { %v1089_v55 = vmul.f32 0.70710677, %v1083_v52  ;;  %v2170_v56 = vpop.f32.mrb[15].mxu0  ;;  %v1088_v15 = vmul.f32 0.5, %v1083_v52 }
 0x904   : > { %v1090_v57 = vand.u32 2147483647, %v1089_v55  ;;  %v1104_v60 = vsub.f32 0.0, %v1089_v55  ;;  %vm1110_vm5 = vcmp.ge.f32.partialorder %v1089_v55, 0.0 }
 0x906   : > { %v1091_v58 = vmul.f32 0.3275911, %v1090_v57  ;;  %v1105_v62 = vmul.f32 %v1104_v60, %v1089_v55 }
 0x908   : > { %v1092_v59 = vadd.f32 1.0, %v1091_v58  ;;  %v1106_v1 = vmul.f32 1.442695, %v1105_v62 }
 0x90a   : > { %2332 = vrcp.f32 %v1092_v59 }
 0x90b   : > { %2334 = vpow2.f32 %v1106_v1 }
 0x914   : > { %v2333_v61 = vpop.eup %2332 }
 0x915   : > { %v1095_v63 = vmul.f32 1.0614054, %v2333_v61  ;;  %v2335_v10 = vpop.eup %2334 }
 0x917   : > { %v1096_v0 = vadd.f32 -1.4531521, %v1095_v63 }
 0x919   : > { %v1097_v2 = vmul.f32 %v2333_v61, %v1096_v0 }
 0x91b   : > { %v1098_v3 = vadd.f32 1.4214138, %v1097_v2 }
 0x91d   : > { %v1099_v4 = vmul.f32 %v2333_v61, %v1098_v3 }
 0x91f   : > { %v1100_v5 = vadd.f32 -0.28449672, %v1099_v4 }
 0x921   : > { %v1101_v6 = vmul.f32 %v2333_v61, %v1100_v5 }
 0x923   : > { %v1102_v7 = vadd.f32 0.2548296, %v1101_v6 }
 0x925   : > { %v1103_v8 = vmul.f32 %v2333_v61, %v1102_v7 }
 0x927   : > { %v1108_v11 = vmul.f32 %v2335_v10, %v1103_v8 }
 0x929   : > { %v1109_v12 = vsub.f32 1.0, %v1108_v11 }
 0x92b   : > { %v1111_v13 = vsub.f32 0.0, %v1109_v12 }
 0x92d   : > { %v1112_v14 = vsel %vm1110_vm5, %v1109_v12, %v1111_v13 }
 0x92e   : > { %v1113_v16 = vadd.f32 1.0, %v1112_v14 }
 0x930   : > { %v1114_v17 = vmul.f32 %v1113_v16, %v1088_v15 }
 0x932   : > { %v1115_v18 = vpack.c.bf16 %v1114_v17, %v1114_v17 }
 0x934   : > { %2180 = vmatmul.mubr.msk.bf16.vlgmr.msra.gmra.mrb[12].mxu1 %vm1155_vm6, %v1115_v18 }
 0x935   : > { %2199 = vmatprep.mubr.msk.bf16.mxu1 %vm2421_vm1, %v2420_v9 }
 0xa07   : > { %v1193_v21 = vpop.f32.mrb[12].mxu1 }
 0xa08   : > { %v1194_v22 = vadd.f32 %v2008_v20, %v1193_v21  ;;  %v2181_v23 = vpop.f32.mrb[13].mxu1 }
 0xa09   : > { %v1196_v24 = vpop.f32.mrb[14].mxu1 }
 0xa0a   : > { %v2182_v25 = vpop.f32.mrb[15].mxu1  ;;  %v1199_v26 = vadd.f32 %v1194_v22, %v1020_v44 }
 0xa0c   : > { %v1202_v27 = vsel %vm590_vm0, %v1199_v26, 0.0 }
 0xa0d   : > { %1203 = vadd.xlane.f32.xlu1 %v1202_v27 }
 0xa9a   : > { %v1204_v28 = vpop.xlane.xlu1 %1203 }
 0xa9b   : > { %v1205_v29 = vmul.f32 0.03125, %v1204_v28 }
 0xa9d   : > { %v1206_v30 = vsub.f32 %v1199_v26, %v1205_v29 }
 0xa9f   : > { %v1207_v31 = vmul.f32 %v1206_v30, %v1206_v30 }
 0xaa1   : > { %v1208_v32 = vsel %vm590_vm0, %v1207_v31, 0.0  ;;  %v2311_v31 = vld [vmem:[%s2897_s6 + $0x18] sm:$0xff]  }
 0xaa2   : > { %1209 = vadd.xlane.f32.xlu1 %v1208_v32 }
 0xb2f   : > { %v1210_v19 = vpop.xlane.xlu1 %1209 }
 0xb30   : > { %v1211_v36 = vmul.f32 0.03125, %v1210_v19 }
 0xb32   : > { %v1212_v37 = vadd.f32 1e-12, %v1211_v36 }
 0xb34   : > { %2336 = vrsqrt.f32 %v1212_v37 }
 0xb3e   : > { %v2337_v38 = vpop.eup %2336 }
 0xb3f   : > { %v1214_v40 = vmul.f32 %v2337_v38, %v1206_v30  ;;  %v2310_v30 = vld [vmem:[%s2897_s6 + $0x10] sm:$0xff]  }
 0xb41   : > { %v1221_v42 = vmul.f32 %v2014_v39, %v1214_v40 }
 0xb43   : > { %v2726_v43 = vadd.f32 %v2015_v41, %v1221_v42 }
 0xb45   : > { %v1229_v44 = vpack.c.bf16 %v2726_v43, %v2726_v43 }
 0xb47   : > { %2188 = vmatmul.mubr.msk.bf16.vlgmr.msra.gmra.mrb[16].mxu0 %vm590_vm0, %v1229_v44  ;;  %v2034_v44 = vld [vmem:[%s2898_s7 + $0x1] ss:$0 sm:$0xff] }
 0xb48   : > { %2193 = vmatprep.mubr.msk.bf16.mxu0 %vm2421_vm1, %v2420_v9 }
 0xc1a   : > { %v1292_v46 = vpop.f32.mrb[16].mxu0 }
 0xc1b   : > { %v1293_v47 = vadd.f32 %v2021_v45, %v1292_v46  ;;  %v2189_v48 = vpop.f32.mrb[17].mxu0 }
 0xc1c   : > { %v1295_v49 = vpop.f32.mrb[18].mxu0 }
 0xc1d   : > { %v1298_v50 = vpack.c.bf16 %v1293_v47, %v1293_v47  ;;  %v2190_v51 = vpop.f32.mrb[19].mxu0 }
 0xc1f   : > { %1412 = vrot.lane.b32.xlu1 %v1298_v50, %s2424_s19  ;;  %1300 = vrot.lane.b32.xlu0 %v1298_v50, %s2932_s21  ;;  %s2934_s19 = smov 64   ;;  %s2936_s21 = smov 16  }
 0xc23   : > { %1410 = vrot.lane.b32.xlu1 %v1298_v50, %s2933_s29  ;;  %s575_s29 = sand.u32 1, %s2410_s28  }
 0xc24   : > { %s1906_s24 = scalar_lea.sflag [#allocation3], %s575_s29 }
 0xc91   : > { %v1301_v52 = vpop.permute.xlu0 %1300  ;;  %v1413_v54 = vpop.permute.xlu1 %1412 }
 0xc92   : > { %v1306_v53 = vsel %vm690_vm2, %v1301_v52, 0  ;;  %v1418_v55 = vsel %vm690_vm2, %v1413_v54, 0 }
 0xc93   : > { %2192 = vmatpush3.bf16.xpose.msra.mxu0 %v1306_v53 }
 0xc94   : > { %2203 = vmatprep.subr.bf16.mxu0 %v2420_v9 }
 0xc95   : > { %v1411_v56 = vpop.permute.xlu1 %1410 }
 0xc9a   : > { %2194 = vmatmul.mubr.msk.bf16.vlgmr.msra.gmra.mrb[20].mxu0 %vm690_vm2, %v1298_v50 }
 0xc9b   : > { %2204 = vmatpush3.bf16.xpose.msra.mxu0 %v1418_v55  ;;  %2205 = vmatprep.mubr.msk.bf16.mxu0 %vm2421_vm1, %v2420_v9 }
 0xc9c   : > { %2215 = vmatprep.subr.bf16.mxu0 %v2420_v9 }
 0xca2   : > { %2206 = vmatmul.mubr.msk.bf16.vlgmr.msra.gmra.mrb[24].mxu0 %vm690_vm2, %v1411_v56 }
 0xca3   : > { %2219 = vmatprep.mubr.msk.bf16.mxu0 %vm2421_vm1, %v2420_v9  ;;  %2216 = vmatpush3.bf16.msra.mxu0 %v2310_v30 }
 0xca4   : > { %2217 = vmatprep.subr.bf16.mxu0 %v2420_v9 }
 0xca7   : > { %2218 = vmatpush3.bf16.msra.mxu0 %v2311_v31 }
 0xca8   : > { %2231 = vmatprep.subr.bf16.mxu0 %v2420_v9 }
 0xd6d   : > { %v1342_v57 = vpop.f32.mrb[20].mxu0 }
 0xd6e   : > { %v1348_v58 = vmul.f32 0.25, %v1342_v57  ;;  %v2195_v59 = vpop.f32.mrb[21].mxu0  ;;  %v2312_v57 = vld [vmem:[%s2901_s10 + $0x10] sm:$0xff]  }
 0xd6f   : > { %v1345_v60 = vpop.f32.mrb[22].mxu0 }
 0xd70   : > { %v2196_v61 = vpop.f32.mrb[23].mxu0  ;;  %v1349_v62 = vadd.f32 %v2629_v34, %v1348_v58  ;;  %v2313_v58 = vld [vmem:[%s2901_s10 + $0x18] sm:$0xff]  }
 0xd72   : > { %v1350_v63 = vsel %vm745_vm3, %v1349_v62, -inf }
 0xd73   : > { %1351 = vmax.xlane.f32.xlu0 %v1350_v63 }
 0xd75   : > { %v1454_v0 = vpop.f32.mrb[24].mxu0 }
 0xd76   : > { %v1460_v1 = vmul.f32 0.25, %v1454_v0  ;;  %v2207_v2 = vpop.f32.mrb[25].mxu0  ;;  %v2041_v0 = vld [vmem:[%s2900_s9 + $0x1] ss:$0 sm:$0xff] }
 0xd77   : > { %v1457_v3 = vpop.f32.mrb[26].mxu0 }
 0xd78   : > { %v2208_v4 = vpop.f32.mrb[27].mxu0  ;;  %v1461_v5 = vadd.f32 %v2629_v34, %v1460_v1 }
 0xd79   : > { %v2314_v4 = vld [vmem:[%s2903_s12 + $0x20] sm:$0xff]  }
 0xd7a   : > { %v1462_v6 = vsel %vm745_vm3, %v1461_v5, -inf }
 0xd7b   : > { %1463 = vmax.xlane.f32.xlu1 %v1462_v6  ;;  %v2316_v6 = vld [vmem:[%s2903_s12 + $0x30] sm:$0xff]  }
 0xd8c   : > { %1362 = vrot.lane.b32.xlu1 %v1298_v50, %s2934_s19  ;;  %s2073_s19 = sshll.u32 %s2545_s0, 4  ;;  %s2428_s0 = smov [#allocation2]  }
 0xd8d   : > { %s2849_s3 = scalar_lea.hbm %s2909_s18, %s2073_s19  ;;  %s2360_s4 = sshll.u32 %s2428_s0, 4  ;;  %s2361_s4 = int_to_ptr.vmem [resolvable:$false] %s2360_s4 }
 0xd8e   : > { %s2362_s5 = scalar_lea.vmem %s2361_s4, 32 }
 0xe00   : > { %v1352_v7 = vpop.xlane.xlu0 %1351 }
 0xe01   : > { %v1353_v8 = vsub.f32 %v1349_v62, %v1352_v7  ;;  %v2040_v62 = vld [vmem:[%s2899_s8 + $0x1] ss:$0 sm:$0xff]  ;;  %v2317_v7 = vld [vmem:[%s2903_s12 + $0x38] sm:$0xff]  }
 0xe03   : > { %v1354_v10 = vmul.f32 1.442695, %v1353_v8  ;;  %v2047_v8 = vld [vmem:[%s2902_s11 + $0x1] ss:$0 sm:$0xff] }
 0xe05   : > { %2338 = vpow2.f32 %v1354_v10 }
 0xe08   : > { %v1464_v11 = vpop.xlane.xlu1 %1463 }
 0xe09   : > { %v1465_v12 = vsub.f32 %v1461_v5, %v1464_v11  ;;  %v2315_v5 = vld [vmem:[%s2903_s12 + $0x28] sm:$0xff]  }
 0xe0b   : > { %v1466_v13 = vmul.f32 1.442695, %v1465_v12 }
 0xe0c   : > { %v1363_v14 = vpop.permute.xlu1 %1362 }
 0xe0d   : > { %2340 = vpow2.f32 %v1466_v13  ;;  %v1368_v15 = vsel %vm763_vm4, %v1363_v14, 0 }
 0xe0e   : > { %2198 = vmatpush3.bf16.msra.mxu1 %v1368_v15 }
 0xe0f   : > { %v2339_v16 = vpop.eup %2338  ;;  %2209 = vmatprep.subr.bf16.mxu1 %v2420_v9 }
 0xe10   : > { %v1356_v34 = vsel %vm745_vm3, %v2339_v16, 0.0 }
 0xe11   : > { %1357 = vadd.xlane.f32.xlu0 %v1356_v34 }
 0xe17   : > { %v2341_v17 = vpop.eup %2340 }
 0xe18   : > { %v1468_v18 = vsel %vm745_vm3, %v2341_v17, 0.0 }
 0xe19   : > { %1469 = vadd.xlane.f32.xlu0 %v1468_v18 }
 0xe2f   : > { %1474 = vrot.lane.b32.xlu0 %v1298_v50, %s2935_s22  ;;  %s576_s22 = scalar_lea.vmem [#allocation2], %s575_s29 }
 0xe30   : > { %s1918_s20 = sshll.u32 %s576_s22, 4  ;;  %s2851_s20 = int_to_ptr.vmem [resolvable:$true] %s1918_s20 }
 0xe31   : > { %p2363_p0 = scmp.lt.s32.totalorder %s2851_s20, %s2361_s4 }
 0xe9e   : > { %v1358_v20 = vpop.xlane.xlu0 %1357 }
 0xe9f   : > { %2342 = vrcp.f32 %v1358_v20 }
 0xea6   : > { %v1470_v21 = vpop.xlane.xlu0 %1469 }
 0xea7   : > { %2344 = vrcp.f32 %v1470_v21 }
 0xea9   : > { %v2343_v22 = vpop.eup %2342 }
 0xeaa   : > { %v1360_v23 = vmul.f32 %v2343_v22, %v2339_v16  ;;  %v1475_v24 = vpop.permute.xlu0 %1474 }
 0xeab   : > { %v1480_v26 = vsel %vm763_vm4, %v1475_v24, 0 }
 0xeac   : > { %v1361_v25 = vpack.c.bf16 %v1360_v23, %v1360_v23 }
 0xeae   : > { %2200 = vmatmul.mubr.msk.bf16.vlgmr.msra.gmra.mrb[16].mxu1 %vm745_vm3, %v1361_v25 }
 0xeaf   : > { %2210 = vmatpush3.bf16.msra.mxu1 %v1480_v26  ;;  %2211 = vmatprep.mubr.msk.bf16.mxu1 %vm2421_vm1, %v2420_v9 }
 0xeb0   : > { %2223 = vmatprep.subr.bf16.mxu1 %v2420_v9 }
 0xeb1   : > { %v2345_v27 = vpop.eup %2344 }
 0xeb2   : > { %v1472_v28 = vmul.f32 %v2345_v27, %v2341_v17 }
 0xeb4   : > { %v1473_v29 = vpack.c.bf16 %v1472_v28, %v1472_v28 }
 0xeb6   : > { %2212 = vmatmul.mubr.msk.bf16.vlgmr.msra.gmra.mrb[20].mxu1 %vm745_vm3, %v1473_v29 }
 0xeb7   : > { %2227 = vmatprep.mubr.msk.bf16.mxu1 %vm2421_vm1, %v2420_v9  ;;  %2224 = vmatpush3.bf16.msra.mxu1 %v2312_v57 }
 0xeb8   : > { %2225 = vmatprep.subr.bf16.mxu1 %v2420_v9 }
 0xebb   : > { %2226 = vmatpush3.bf16.msra.mxu1 %v2313_v58 }
 0xebc   : > { %2243 = vmatprep.subr.bf16.mxu1 %v2420_v9 }
 0xf81   : > { %v1404_v32 = vpop.f32.mrb[16].mxu1 }
 0xf82   : > { %v2201_v33 = vpop.f32.mrb[17].mxu1 }
 0xf83   : > { %v1407_v35 = vpop.f32.mrb[18].mxu1 }
 0xf84   : > { %v2202_v19 = vpop.f32.mrb[19].mxu1 }
 0xf89   : > { %v1516_v36 = vpop.f32.mrb[20].mxu1 }
 0xf8a   : > { %1523 = vrot.lane.b32.xlu1 %v1516_v36, %s2936_s21  ;;  %v2213_v37 = vpop.f32.mrb[21].mxu1  ;;  %s2356_s21 = scalar_lea.vmem %s2851_s20, 16 }
 0xf8b   : > { %v1519_v38 = vpop.f32.mrb[22].mxu1  ;;  %p2357_p11 = scmp.ne.s32.totalorder %s2851_s20, %s2356_s21  ;;  %p2364_p1 = scmp.lt.s32.totalorder %s2362_s5, %s2356_s21 }
 0xf8c   : > { %v2214_v39 = vpop.f32.mrb[23].mxu1 }
 0xf8d   : > { %p2358_p12 = pnand %p2357_p11, %p2562_p5  ;;  %p2365_p2 = por %p2364_p1, %p2363_p0 }
 0xf8f   : > { %p2359_p13 = pneg %p2358_p12 }
 0xf91   : > { %p2366_p3 = pnand %p2365_p2, %p2359_p13 }
 0xffc   : > { %v1524_v40 = vpop.permute.xlu1 %1523 }
 0xffd   : > { %v1526_v41 = vsel %vm690_vm2, %v1404_v32, %v1524_v40 }
 0xffe   : > { %v1527_v42 = vpack.c.bf16 %v1526_v41, %v1526_v41  ;;  %v2060_v41 = vld [vmem:[%s2904_s13 + $0x1] ss:$0 sm:$0xff] }
0x1000   : > { %2220 = vmatmul.mubr.msk.bf16.vlgmr.msra.gmra.mrb[28].mxu0 %vm590_vm0, %v1527_v42 }
0x1001   : > { %2239 = vmatprep.mubr.msk.bf16.mxu0 %vm2421_vm1, %v2420_v9  ;;  %2232 = vmatpush3.bf16.msra.mxu0 %v2314_v4 }
0x1002   : > { %2233 = vmatprep.subr.bf16.mxu0 %v2420_v9 }
0x1005   : > { %2234 = vmatpush3.bf16.msra.mxu0 %v2315_v5 }
0x1006   : > { %2235 = vmatprep.subr.bf16.mxu0 %v2420_v9 }
0x1009   : > { %2236 = vmatpush3.bf16.msra.mxu0 %v2316_v6 }
0x100a   : > { %2237 = vmatprep.subr.bf16.mxu0 %v2420_v9 }
0x100d   : > { %2238 = vmatpush3.bf16.msra.mxu0 %v2317_v7 }
0x10d3   : > { %v1590_v45 = vpop.f32.mrb[28].mxu0 }
0x10d4   : > { %v1591_v46 = vadd.f32 %v2034_v44, %v1590_v45  ;;  %v2221_v47 = vpop.f32.mrb[29].mxu0 }
0x10d5   : > { %v1593_v48 = vpop.f32.mrb[30].mxu0 }
0x10d6   : > { %v2222_v49 = vpop.f32.mrb[31].mxu0  ;;  %v1596_v50 = vadd.f32 %v1591_v46, %v2726_v43 }
0x10d8   : > { %v1601_v51 = vsel %vm590_vm0, %v1596_v50, 0.0 }
0x10d9   : > { %1602 = vadd.xlane.f32.xlu1 %v1601_v51 }
0x1166   : > { %v1603_v52 = vpop.xlane.xlu1 %1602 }
0x1167   : > { %v1604_v53 = vmul.f32 0.03125, %v1603_v52 }
0x1169   : > { %v1605_v54 = vsub.f32 %v1596_v50, %v1604_v53 }
0x116b   : > { %v1606_v55 = vmul.f32 %v1605_v54, %v1605_v54 }
0x116d   : > { %v1607_v56 = vsel %vm590_vm0, %v1606_v55, 0.0  ;;  %v2318_v55 = vld [vmem:[%s2907_s16] sm:$0xff]  }
0x116e   : > { %1608 = vadd.xlane.f32.xlu0 %v1607_v56  ;;  %v2319_v56 = vld [vmem:[%s2907_s16 + $0x8] sm:$0xff]  }
0x11fb   : > { %v1609_v43 = vpop.xlane.xlu0 %1608 }
0x11fc   : > { %v1610_v59 = vmul.f32 0.03125, %v1609_v43 }
0x11fe   : > { %v1611_v60 = vadd.f32 1e-12, %v1610_v59 }
0x1200   : > { %2346 = vrsqrt.f32 %v1611_v60  ;;  %v2068_v60 = vld [vmem:[%s2905_s14 + $0x1] ss:$0 sm:$0xff] }
0x120a   : > { %v2347_v61 = vpop.eup %2346 }
0x120b   : > { %v1613_v63 = vmul.f32 %v2347_v61, %v1605_v54 }
0x120d   : > { %v1620_v1 = vmul.f32 %v2040_v62, %v1613_v63  ;;  %v2069_v62 = vld [vmem:[%s2906_s15 + $0x1] ss:$0 sm:$0xff] }
0x120f   : > { %v1627_v2 = vadd.f32 %v2041_v0, %v1620_v1  ;;  %v1846_v1 = vld [vmem:[%s2908_s17] sm:$0x1] }
0x1211   : > { %v1628_v3 = vpack.c.bf16 %v1627_v2, %v1627_v2 }
0x1213   : > { %2228 = vmatmul.mubr.msk.bf16.vlgmr.msra.gmra.mrb[24].mxu1 %vm590_vm0, %v1628_v3 }
0x1214   : > { %2247 = vmatprep.mubr.msk.bf16.mxu1 %vm2421_vm1, %v2420_v9  ;;  %2244 = vmatpush3.bf16.msra.mxu1 %v2318_v55 }
0x1215   : > { %2245 = vmatprep.subr.bf16.mxu1 %v2420_v9 }
0x1218   : > { %2246 = vmatpush3.bf16.msra.mxu1 %v2319_v56 }
0x12e6   : > { %v1691_v10 = vpop.f32.mrb[24].mxu1 }
0x12e7   : > { %v1692_v11 = vadd.f32 %v2047_v8, %v1691_v10  ;;  %v2229_v12 = vpop.f32.mrb[25].mxu1 }
0x12e8   : > { %v1694_v13 = vpop.f32.mrb[26].mxu1 }
0x12e9   : > { %v1698_v14 = vmul.f32 0.70710677, %v1692_v11  ;;  %v2230_v15 = vpop.f32.mrb[27].mxu1  ;;  %v1697_v37 = vmul.f32 0.5, %v1692_v11 }
0x12eb   : > { %v1699_v16 = vand.u32 2147483647, %v1698_v14  ;;  %v1713_v18 = vsub.f32 0.0, %v1698_v14  ;;  %vm1719_vm7 = vcmp.ge.f32.partialorder %v1698_v14, 0.0 }
0x12ed   : > { %v1700_v34 = vmul.f32 0.3275911, %v1699_v16  ;;  %v1714_v21 = vmul.f32 %v1713_v18, %v1698_v14 }
0x12ef   : > { %v1701_v17 = vadd.f32 1.0, %v1700_v34  ;;  %v1715_v24 = vmul.f32 1.442695, %v1714_v21 }
0x12f1   : > { %2348 = vrcp.f32 %v1701_v17 }
0x12f2   : > { %2350 = vpow2.f32 %v1715_v24 }
0x12fb   : > { %v2349_v20 = vpop.eup %2348 }
0x12fc   : > { %v1704_v22 = vmul.f32 1.0614054, %v2349_v20  ;;  %v2351_v32 = vpop.eup %2350 }
0x12fe   : > { %v1705_v23 = vadd.f32 -1.4531521, %v1704_v22 }
0x1300   : > { %v1706_v25 = vmul.f32 %v2349_v20, %v1705_v23 }
0x1302   : > { %v1707_v26 = vadd.f32 1.4214138, %v1706_v25 }
0x1304   : > { %v1708_v27 = vmul.f32 %v2349_v20, %v1707_v26 }
0x1306   : > { %v1709_v28 = vadd.f32 -0.28449672, %v1708_v27 }
0x1308   : > { %v1710_v29 = vmul.f32 %v2349_v20, %v1709_v28 }
0x130a   : > { %v1711_v30 = vadd.f32 0.2548296, %v1710_v29 }
0x130c   : > { %v1712_v31 = vmul.f32 %v2349_v20, %v1711_v30 }
0x130e   : > { %v1717_v33 = vmul.f32 %v2351_v32, %v1712_v31 }
0x1310   : > { %v1718_v35 = vsub.f32 1.0, %v1717_v33 }
0x1312   : > { %v1720_v19 = vsub.f32 0.0, %v1718_v35 }
0x1314   : > { %v1721_v36 = vsel %vm1719_vm7, %v1718_v35, %v1720_v19 }
0x1315   : > { %v1722_v38 = vadd.f32 1.0, %v1721_v36 }
0x1317   : > { %v1723_v39 = vmul.f32 %v1722_v38, %v1697_v37 }
0x1319   : > { %v1724_v40 = vpack.c.bf16 %v1723_v39, %v1723_v39 }
0x131b   : > { %2240 = vmatmul.mubr.msk.bf16.vlgmr.msra.gmra.mrb[32].mxu0 %vm1155_vm6, %v1724_v40 }
0x13ee   : > { %v1803_v42 = vpop.f32.mrb[32].mxu0 }
0x13ef   : > { %v1804_v44 = vadd.f32 %v2060_v41, %v1803_v42  ;;  %v2241_v45 = vpop.f32.mrb[33].mxu0 }
0x13f0   : > { %v1806_v46 = vpop.f32.mrb[34].mxu0 }
0x13f1   : > { %v2242_v47 = vpop.f32.mrb[35].mxu0  ;;  %v1809_v48 = vadd.f32 %v1804_v44, %v1627_v2 }
0x13f3   : > { %v1814_v49 = vsel %vm590_vm0, %v1809_v48, 0.0 }
0x13f4   : > { %1815 = vadd.xlane.f32.xlu0 %v1814_v49 }
0x1481   : > { %v1816_v50 = vpop.xlane.xlu0 %1815 }
0x1482   : > { %v1817_v51 = vmul.f32 0.03125, %v1816_v50 }
0x1484   : > { %v1818_v52 = vsub.f32 %v1809_v48, %v1817_v51 }
0x1486   : > { %v1819_v53 = vmul.f32 %v1818_v52, %v1818_v52 }
0x1488   : > { %v1820_v54 = vsel %vm590_vm0, %v1819_v53, 0.0 }
0x1489   : > { %1821 = vadd.xlane.f32.xlu1 %v1820_v54 }
0x1516   : > { %v1822_v57 = vpop.xlane.xlu1 %1821 }
0x1517   : > { %v1823_v58 = vmul.f32 0.03125, %v1822_v57 }
0x1519   : > { %v1824_v43 = vadd.f32 1e-12, %v1823_v58 }
0x151b   : > { %2352 = vrsqrt.f32 %v1824_v43 }
0x1525   : > { %v2353_v59 = vpop.eup %2352 }
0x1526   : > { %v1826_v61 = vmul.f32 %v2353_v59, %v1818_v52 }
0x1528   : > { %v1833_v63 = vmul.f32 %v2068_v60, %v1826_v61 }
0x152a   : > { %v1840_v0 = vadd.f32 %v2069_v62, %v1833_v63 }
0x152c   : > { %v1841_v9 = vpack.c.bf16 %v1840_v0, %v1840_v0 }
0x152e   : > { %2248 = vmatmul.mubr.msk.bf16.vlgmr.msra.gmra.mrb[28].mxu1 %vm590_vm0, %v1841_v9 }
0x1601   : > { %v1896_v2 = vpop.f32.mrb[28].mxu1 }
0x1602   : > { %v1897_v3 = vadd.f32 %v1896_v2, %v1846_v1  ;;  %v2249_v4 = vpop.f32.mrb[29].mxu1 }
0x1603   : > { %v1899_v5 = vpop.f32.mrb[30].mxu1 }
0x1604   : > { %2354 = vtanh.f32 %v1897_v3  ;;  %v2250_v6 = vpop.f32.mrb[31].mxu1 }
0x160e   : > { %v2355_v7 = vpop.eup %2354 }
0x160f   : > { %1904 = vst.msk [vmem:[%s576_s22] sm:$0x1] %vm1903_vm8, %v2355_v7 }
0x1610   : > { %2369 = shalt.err (!%p2366_p3)
}
0x1611   : > { %s2370_s29 = scalar_lea.hbm %s2849_s3, 16  ;;  %s2374_s25 = scalar_lea.hbm %s2909_s18, 32 }
0x1612   : > { %p2371_p4 = scmp.ne.s32.totalorder %s2849_s3, %s2370_s29  ;;  %p2375_p9 = scmp.lt.u32.totalorder %s2849_s3, %s2909_s18 }
0x1613   : > { %p2376_p10 = scmp.lt.u32.totalorder %s2374_s25, %s2370_s29  ;;  %p2378_p12 = scmp.lt.u32.totalorder %s2370_s29, %s2849_s3 }
0x1614   : > { %p2372_p7 = pnand %p2371_p4, %p2562_p5 }
0x1615   : > { %p2377_p11 = por %p2376_p10, %p2375_p9 }
0x1616   : > { %p2373_p8 = pneg %p2372_p7 }
0x1617   : > { %p2379_p13 = por %p2378_p12, %p2377_p11 }
0x1619   : > { %p2380_p0 = pnand %p2379_p13, %p2373_p8 }
0x161b   : > { %2383 = shalt.err (!%p2380_p0)
}
0x161c   : > { %2251 = dma.vmem_to_hbm [thread:$0]  (%p2562_p5), %s2851_s20, 16, %s2849_s3, %s1906_s24  }
0x161d PF: > { %p2257_p1 = scmp.ge.s32.totalorder %s2418_s30, 2  ;;  %s1930_s5 = sand.u32 1, %s2406_s27  }
0x161e   : > { %s1931_s21 = scalar_lea.sflag [#allocation3], %s1930_s5 }
0x161f   : > { %p2254_p2 = pnand %p2257_p1, %p2566_p6 }
0x1621   : > { %2401 = dma.done.wait (!%p2254_p2), %s1931_s21, 16  }
0x1622   : > { %2403 = vsyncadd (!%p2254_p2), %s1931_s21, 4294967280  ;;  %s2937_s0 = sld [smem:[#allocation5_spill]]  ;;  %s2938_s29 = sld [smem:[#allocation6_spill]] }
0x1623   : > { %p28_p3 = scmp.ge.s32.totalorder %s2549_s1, 4   ;;  %s2939_s27 = smov %s2410_s28 }
0x1624   : > { %s2941_s30 = smov %s2549_s1 }
0x1625   :  { %30 = sbr.rel (!%p28_p3) target bundleno = 10 (0xa), region = 142 }
0x1628   : > { %s2940_s28 = smov %s2937_s0 }
0x162c   :  { %1935 = vsyncpa [#allocation3], 1 }
0x162d   :  { %1937 = vsyncpa [#allocation3 + $0x1], 1 }

</bundles_post_ra>
